<compile_context>
chip_gen: v7x
topology: tpu7x:2x2x1
jax: 0.10.0
libtpu: 0.0.40
codegen_flags: <defaults>
</compile_context>

<pallas_src>
import functools

import jax
import jax.numpy as jnp
from jax.experimental import pallas as pl
from jax.experimental.pallas import tpu as pltpu


# torchvision vgg16.features layer sequence (index -> layer kind).
VGG16_FEATURES_CFG = [
    ("conv", 3, 64), ("relu",), ("conv", 64, 64), ("relu",), ("pool",),
    ("conv", 64, 128), ("relu",), ("conv", 128, 128), ("relu",), ("pool",),
    ("conv", 128, 256), ("relu",), ("conv", 256, 256), ("relu",),
    ("conv", 256, 256), ("relu",), ("pool",),
    ("conv", 256, 512), ("relu",), ("conv", 512, 512), ("relu",),
    ("conv", 512, 512), ("relu",), ("pool",),
    ("conv", 512, 512), ("relu",), ("conv", 512, 512), ("relu",),
    ("conv", 512, 512), ("relu",), ("pool",),
]


# ----------------------------- conv 3x3 (pad 1) -----------------------------

def _conv3x3_kernel(xp_ref, w_ref, b_ref, o_ref, *, H, W, apply_relu):
    """xp_ref: (1, H+2, W+2, Cin) zero-padded NHWC input for one batch element.
    w_ref: (3, 3, Cin, Cout) HWIO weights (resident), b_ref: (1, Cout).
    o_ref: (1, H*W, Cout) flattened-spatial output."""
    cin = w_ref.shape[2]
    cout = w_ref.shape[3]
    acc = jnp.zeros((H * W, cout), jnp.float32)
    for dy in range(3):
        for dx in range(3):
            xs = xp_ref[0, dy:dy + H, dx:dx + W, :]          # (H, W, Cin)
            # W is a multiple of 8 here, so this fold is layout-preserving.
            xs = xs.reshape(H * W, cin)
            acc = acc + jnp.dot(xs, w_ref[dy, dx],
                                preferred_element_type=jnp.float32)
    acc = acc + b_ref[...]                                   # (1, Cout) broadcast
    if apply_relu:
        acc = jnp.maximum(acc, 0.0)
    o_ref[0] = acc.astype(o_ref.dtype)


def conv3x3(x, w, b, *, relu):
    """3x3 conv, stride 1, padding 1.  x: (N,H,W,Cin) NHWC; w: (3,3,Cin,Cout)."""
    N, H, W, Cin = x.shape
    Cout = w.shape[-1]
    xp = jnp.pad(x, ((0, 0), (1, 1), (1, 1), (0, 0)))
    b2 = b.reshape(1, Cout).astype(jnp.float32)
    kernel = functools.partial(_conv3x3_kernel, H=H, W=W, apply_relu=relu)
    out = pl.pallas_call(
        kernel,
        out_shape=jax.ShapeDtypeStruct((N, H * W, Cout), x.dtype),
        grid_spec=pltpu.PrefetchScalarGridSpec(
            num_scalar_prefetch=0,
            grid=(N,),
            in_specs=[
                pl.BlockSpec((1, H + 2, W + 2, Cin), lambda n: (n, 0, 0, 0)),
                pl.BlockSpec((3, 3, Cin, Cout), lambda n: (0, 0, 0, 0)),
                pl.BlockSpec((1, Cout), lambda n: (0, 0)),
            ],
            out_specs=pl.BlockSpec((1, H * W, Cout), lambda n: (n, 0, 0)),
        ),
        compiler_params=pltpu.CompilerParams(
            dimension_semantics=("parallel",)),
    )(xp, w, b2)
    return out.reshape(N, H, W, Cout)


# ---------------------------------- ReLU ------------------------------------

def _relu_kernel(x_ref, o_ref):
    o_ref[...] = jnp.maximum(x_ref[...], 0.0)


def relu_nhwc(x):
    N = x.shape[0]
    blk = (1,) + tuple(x.shape[1:])
    ndim = x.ndim
    idx = lambda n: (n,) + (0,) * (ndim - 1)
    return pl.pallas_call(
        _relu_kernel,
        out_shape=jax.ShapeDtypeStruct(x.shape, x.dtype),
        grid_spec=pltpu.PrefetchScalarGridSpec(
            num_scalar_prefetch=0,
            grid=(N,),
            in_specs=[pl.BlockSpec(blk, idx)],
            out_specs=pl.BlockSpec(blk, idx),
        ),
        compiler_params=pltpu.CompilerParams(
            dimension_semantics=("parallel",)),
    )(x)


# ------------------------------ maxpool 2x2 ---------------------------------

def _maxpool2x2_kernel(x_ref, o_ref, *, C):
    v = x_ref[0]                                   # (Ho, 2, Wo, 2*C)
    m = jnp.maximum(v[..., :C], v[..., C:])        # pair-max along W -> (Ho, 2, Wo, C)
    o_ref[0] = jnp.maximum(m[:, 0], m[:, 1])       # pair-max along H -> (Ho, Wo, C)


def maxpool2x2(x):
    """MaxPool2d(kernel=2, stride=2).  x: (N, H, W, C) NHWC with even H, W."""
    N, H, W, C = x.shape
    Ho, Wo = H // 2, W // 2
    xv = x.reshape(N, Ho, 2, Wo, 2 * C)            # metadata-only reshape
    return pl.pallas_call(
        functools.partial(_maxpool2x2_kernel, C=C),
        out_shape=jax.ShapeDtypeStruct((N, Ho, Wo, C), x.dtype),
        grid_spec=pltpu.PrefetchScalarGridSpec(
            num_scalar_prefetch=0,
            grid=(N,),
            in_specs=[pl.BlockSpec((1, Ho, 2, Wo, 2 * C),
                                   lambda n: (n, 0, 0, 0, 0))],
            out_specs=pl.BlockSpec((1, Ho, Wo, C), lambda n: (n, 0, 0, 0)),
        ),
        compiler_params=pltpu.CompilerParams(
            dimension_semantics=("parallel",)),
    )(xv)


# ------------------------------ params / forward ----------------------------

def init_vgg16_params(key, last_layer):
    """Deterministic random weights, PyTorch Conv2d-style uniform bounds."""
    params = {}
    for i, layer in enumerate(VGG16_FEATURES_CFG[: last_layer + 1]):
        if layer[0] != "conv":
            continue
        _, cin, cout = layer
        key, kw, kb = jax.random.split(key, 3)
        fan_in = cin * 9
        bound = 1.0 / (fan_in ** 0.5)
        w = jax.random.uniform(kw, (3, 3, cin, cout), minval=-bound,
                               maxval=bound, dtype=jnp.float32)
        b = jax.random.uniform(kb, (cout,), minval=-bound, maxval=bound,
                               dtype=jnp.float32)
        params[i] = (w, b)
    return params


def net_vgg_features(img_nchw, params, layer_ids):
    """Pallas forward matching NetVGGFeatures.forward; returns NCHW outputs."""
    last = layer_ids[-1]
    lid = set(layer_ids)

    x = img_nchw
    if x.shape[1] == 1:                            # LambdaLayer: grayscale -> RGB
        x = jnp.repeat(x, 3, axis=1)
    x = jnp.transpose(x, (0, 2, 3, 1))             # NCHW -> NHWC (3 channels, tiny)

    outputs = []

    def capture(t):
        outputs.append(jnp.transpose(t, (0, 3, 1, 2)))   # back to PyTorch NCHW

    i = 0
    while i <= last:
        kind = VGG16_FEATURES_CFG[i][0]
        if kind == "conv":
            w, b = params[i]
            # Fuse the following ReLU unless this conv's (pre-ReLU) output is captured.
            fuse = (i + 1 <= last
                    and VGG16_FEATURES_CFG[i + 1][0] == "relu"
                    and i not in lid)
            x = conv3x3(x, w, b, relu=fuse)
            if i in lid:
                capture(x)
            if fuse:
                if (i + 1) in lid:
                    capture(x)
                i += 2
                continue
        elif kind == "relu":
            x = relu_nhwc(x)
            if i in lid:
                capture(x)
        else:  # pool
            x = maxpool2x2(x)
            if i in lid:
                capture(x)
        i += 1
    return outputs


def net_vgg_features_reference(img_nchw, params, layer_ids):
    """Plain-JAX (NCHW) reference mirroring the PyTorch loop exactly."""
    last = layer_ids[-1]
    lid = set(layer_ids)
    x = img_nchw
    if x.shape[1] == 1:
        x = jnp.repeat(x, 3, axis=1)
    outs = []
    for i in range(last + 1):
        kind = VGG16_FEATURES_CFG[i][0]
        if kind == "conv":
            w, b = params[i]
            x = jax.lax.conv_general_dilated(
                x, w, window_strides=(1, 1), padding=((1, 1), (1, 1)),
                dimension_numbers=("NCHW", "HWIO", "NCHW"),
                precision=jax.lax.Precision.HIGHEST,
            ) + b[None, :, None, None]
        elif kind == "relu":
            x = jnp.maximum(x, 0.0)
        else:
            x = jax.lax.reduce_window(x, -jnp.inf, jax.lax.max,
                                      (1, 1, 2, 2), (1, 1, 2, 2), "VALID")
        if i in lid:
            outs.append(x)
    return outs


if __name__ == "__main__":
    key = jax.random.PRNGKey(0)
    k_img, k_par = jax.random.split(key)

    # Small config: capture conv1_2 (idx 2) and conv2_2 (idx 7), grayscale input
    # to exercise the repeat_interleave branch.
    layer_ids = [2, 7]
    img = jax.random.normal(k_img, (2, 1, 16, 16), dtype=jnp.float32)
    params = init_vgg16_params(k_par, layer_ids[-1])

    outs = net_vgg_features(img, params, layer_ids)
    outs = jax.block_until_ready(outs)

    refs = net_vgg_features_reference(img, params, layer_ids)
    expected_shapes = [(2, 64, 16, 16), (2, 128, 8, 8)]
    assert len(outs) == len(layer_ids)
    for o, r, s in zip(outs, refs, expected_shapes):
        assert o.shape == s, (o.shape, s)
        assert r.shape == s, (r.shape, s)
        assert jnp.allclose(o, r, atol=2e-3, rtol=2e-3), \
            float(jnp.max(jnp.abs(o - r)))

    print("KERNEL_OK")
</pallas_src>

<mosaic_0001>
module attributes {stable_mosaic.version = 11 : i64} {
  func.func @_conv3x3_kernel(%arg0: i32, %arg1: memref<1x18x18x3xf32, #tpu.memory_space<vmem>>, %arg2: memref<3x3x3x64xf32, #tpu.memory_space<vmem>>, %arg3: memref<1x64xf32, #tpu.memory_space<vmem>>, %arg4: memref<1x256x64xf32, #tpu.memory_space<vmem>>) attributes {dimension_semantics = [#tpu.dimension_semantics<parallel>], iteration_bounds = array<i64: 2>, scalar_prefetch = 0 : i64, scratch_operands = 0 : i64, tpu.core_type = #tpu.core_type<tc>, window_params = [{transform_indices = @transform_0, window_bounds = array<i64: 1, 18, 18, 3>}, {pipeline_mode = #tpu.pipeline_mode<synchronous>, transform_indices = @transform_1, window_bounds = array<i64: 3, 3, 3, 64>}, {pipeline_mode = #tpu.pipeline_mode<synchronous>, transform_indices = @transform_2, window_bounds = array<i64: 1, 64>}, {transform_indices = @transform_3, window_bounds = array<i64: 1, 256, 64>}]} {
    %cst = arith.constant 0.000000e+00 : f32
    %0 = vector.broadcast %cst : f32 to vector<256x64xf32>
    %c0 = arith.constant 0 : index
    %c0_0 = arith.constant 0 : index
    %c0_1 = arith.constant 0 : index
    %c0_2 = arith.constant 0 : index
    %1 = vector.load %arg1[%c0, %c0_0, %c0_1, %c0_2] : memref<1x18x18x3xf32, #tpu.memory_space<vmem>>, vector<1x16x16x3xf32>
    %2 = vector.shape_cast %1 : vector<1x16x16x3xf32> to vector<16x16x3xf32>
    %3 = vector.shape_cast %2 : vector<16x16x3xf32> to vector<256x3xf32>
    %c0_3 = arith.constant 0 : index
    %c0_4 = arith.constant 0 : index
    %c0_5 = arith.constant 0 : index
    %c0_6 = arith.constant 0 : index
    %4 = vector.load %arg2[%c0_3, %c0_4, %c0_5, %c0_6] : memref<3x3x3x64xf32, #tpu.memory_space<vmem>>, vector<1x1x3x64xf32>
    %5 = vector.shape_cast %4 : vector<1x1x3x64xf32> to vector<3x64xf32>
    %cst_7 = arith.constant dense<0.000000e+00> : vector<256x64xf32>
    %6 = tpu.matmul %3, %5, %cst_7 {dimension_numbers = #tpu.dot_dimension_numbers<[1], [0], [0], [1], [0, 0, 1, 1], [], []>} : vector<256x3xf32>, vector<3x64xf32>, vector<256x64xf32> -> vector<256x64xf32>
    %7 = arith.addf %0, %6 : vector<256x64xf32>
    %c0_8 = arith.constant 0 : index
    %c0_9 = arith.constant 0 : index
    %c1 = arith.constant 1 : index
    %c0_10 = arith.constant 0 : index
    %8 = vector.load %arg1[%c0_8, %c0_9, %c1, %c0_10] : memref<1x18x18x3xf32, #tpu.memory_space<vmem>>, vector<1x16x16x3xf32>
    %9 = vector.shape_cast %8 : vector<1x16x16x3xf32> to vector<16x16x3xf32>
    %10 = vector.shape_cast %9 : vector<16x16x3xf32> to vector<256x3xf32>
    %c0_11 = arith.constant 0 : index
    %c1_12 = arith.constant 1 : index
    %c0_13 = arith.constant 0 : index
    %c0_14 = arith.constant 0 : index
    %11 = vector.load %arg2[%c0_11, %c1_12, %c0_13, %c0_14] : memref<3x3x3x64xf32, #tpu.memory_space<vmem>>, vector<1x1x3x64xf32>
    %12 = vector.shape_cast %11 : vector<1x1x3x64xf32> to vector<3x64xf32>
    %cst_15 = arith.constant dense<0.000000e+00> : vector<256x64xf32>
    %13 = tpu.matmul %10, %12, %cst_15 {dimension_numbers = #tpu.dot_dimension_numbers<[1], [0], [0], [1], [0, 0, 1, 1], [], []>} : vector<256x3xf32>, vector<3x64xf32>, vector<256x64xf32> -> vector<256x64xf32>
    %14 = arith.addf %7, %13 : vector<256x64xf32>
    %c0_16 = arith.constant 0 : index
    %c0_17 = arith.constant 0 : index
    %c2 = arith.constant 2 : index
    %c0_18 = arith.constant 0 : index
    %15 = vector.load %arg1[%c0_16, %c0_17, %c2, %c0_18] : memref<1x18x18x3xf32, #tpu.memory_space<vmem>>, vector<1x16x16x3xf32>
    %16 = vector.shape_cast %15 : vector<1x16x16x3xf32> to vector<16x16x3xf32>
    %17 = vector.shape_cast %16 : vector<16x16x3xf32> to vector<256x3xf32>
    %c0_19 = arith.constant 0 : index
    %c2_20 = arith.constant 2 : index
    %c0_21 = arith.constant 0 : index
    %c0_22 = arith.constant 0 : index
    %18 = vector.load %arg2[%c0_19, %c2_20, %c0_21, %c0_22] : memref<3x3x3x64xf32, #tpu.memory_space<vmem>>, vector<1x1x3x64xf32>
    %19 = vector.shape_cast %18 : vector<1x1x3x64xf32> to vector<3x64xf32>
    %cst_23 = arith.constant dense<0.000000e+00> : vector<256x64xf32>
    %20 = tpu.matmul %17, %19, %cst_23 {dimension_numbers = #tpu.dot_dimension_numbers<[1], [0], [0], [1], [0, 0, 1, 1], [], []>} : vector<256x3xf32>, vector<3x64xf32>, vector<256x64xf32> -> vector<256x64xf32>
    %21 = arith.addf %14, %20 : vector<256x64xf32>
    %c0_24 = arith.constant 0 : index
    %c1_25 = arith.constant 1 : index
    %c0_26 = arith.constant 0 : index
    %c0_27 = arith.constant 0 : index
    %22 = vector.load %arg1[%c0_24, %c1_25, %c0_26, %c0_27] : memref<1x18x18x3xf32, #tpu.memory_space<vmem>>, vector<1x16x16x3xf32>
    %23 = vector.shape_cast %22 : vector<1x16x16x3xf32> to vector<16x16x3xf32>
    %24 = vector.shape_cast %23 : vector<16x16x3xf32> to vector<256x3xf32>
    %c1_28 = arith.constant 1 : index
    %c0_29 = arith.constant 0 : index
    %c0_30 = arith.constant 0 : index
    %c0_31 = arith.constant 0 : index
    %25 = vector.load %arg2[%c1_28, %c0_29, %c0_30, %c0_31] : memref<3x3x3x64xf32, #tpu.memory_space<vmem>>, vector<1x1x3x64xf32>
    %26 = vector.shape_cast %25 : vector<1x1x3x64xf32> to vector<3x64xf32>
    %cst_32 = arith.constant dense<0.000000e+00> : vector<256x64xf32>
    %27 = tpu.matmul %24, %26, %cst_32 {dimension_numbers = #tpu.dot_dimension_numbers<[1], [0], [0], [1], [0, 0, 1, 1], [], []>} : vector<256x3xf32>, vector<3x64xf32>, vector<256x64xf32> -> vector<256x64xf32>
    %28 = arith.addf %21, %27 : vector<256x64xf32>
    %c0_33 = arith.constant 0 : index
    %c1_34 = arith.constant 1 : index
    %c1_35 = arith.constant 1 : index
    %c0_36 = arith.constant 0 : index
    %29 = vector.load %arg1[%c0_33, %c1_34, %c1_35, %c0_36] : memref<1x18x18x3xf32, #tpu.memory_space<vmem>>, vector<1x16x16x3xf32>
    %30 = vector.shape_cast %29 : vector<1x16x16x3xf32> to vector<16x16x3xf32>
    %31 = vector.shape_cast %30 : vector<16x16x3xf32> to vector<256x3xf32>
    %c1_37 = arith.constant 1 : index
    %c1_38 = arith.constant 1 : index
    %c0_39 = arith.constant 0 : index
    %c0_40 = arith.constant 0 : index
    %32 = vector.load %arg2[%c1_37, %c1_38, %c0_39, %c0_40] : memref<3x3x3x64xf32, #tpu.memory_space<vmem>>, vector<1x1x3x64xf32>
    %33 = vector.shape_cast %32 : vector<1x1x3x64xf32> to vector<3x64xf32>
    %cst_41 = arith.constant dense<0.000000e+00> : vector<256x64xf32>
    %34 = tpu.matmul %31, %33, %cst_41 {dimension_numbers = #tpu.dot_dimension_numbers<[1], [0], [0], [1], [0, 0, 1, 1], [], []>} : vector<256x3xf32>, vector<3x64xf32>, vector<256x64xf32> -> vector<256x64xf32>
    %35 = arith.addf %28, %34 : vector<256x64xf32>
    %c0_42 = arith.constant 0 : index
    %c1_43 = arith.constant 1 : index
    %c2_44 = arith.constant 2 : index
    %c0_45 = arith.constant 0 : index
    %36 = vector.load %arg1[%c0_42, %c1_43, %c2_44, %c0_45] : memref<1x18x18x3xf32, #tpu.memory_space<vmem>>, vector<1x16x16x3xf32>
    %37 = vector.shape_cast %36 : vector<1x16x16x3xf32> to vector<16x16x3xf32>
    %38 = vector.shape_cast %37 : vector<16x16x3xf32> to vector<256x3xf32>
    %c1_46 = arith.constant 1 : index
    %c2_47 = arith.constant 2 : index
    %c0_48 = arith.constant 0 : index
    %c0_49 = arith.constant 0 : index
    %39 = vector.load %arg2[%c1_46, %c2_47, %c0_48, %c0_49] : memref<3x3x3x64xf32, #tpu.memory_space<vmem>>, vector<1x1x3x64xf32>
    %40 = vector.shape_cast %39 : vector<1x1x3x64xf32> to vector<3x64xf32>
    %cst_50 = arith.constant dense<0.000000e+00> : vector<256x64xf32>
    %41 = tpu.matmul %38, %40, %cst_50 {dimension_numbers = #tpu.dot_dimension_numbers<[1], [0], [0], [1], [0, 0, 1, 1], [], []>} : vector<256x3xf32>, vector<3x64xf32>, vector<256x64xf32> -> vector<256x64xf32>
    %42 = arith.addf %35, %41 : vector<256x64xf32>
    %c0_51 = arith.constant 0 : index
    %c2_52 = arith.constant 2 : index
    %c0_53 = arith.constant 0 : index
    %c0_54 = arith.constant 0 : index
    %43 = vector.load %arg1[%c0_51, %c2_52, %c0_53, %c0_54] : memref<1x18x18x3xf32, #tpu.memory_space<vmem>>, vector<1x16x16x3xf32>
    %44 = vector.shape_cast %43 : vector<1x16x16x3xf32> to vector<16x16x3xf32>
    %45 = vector.shape_cast %44 : vector<16x16x3xf32> to vector<256x3xf32>
    %c2_55 = arith.constant 2 : index
    %c0_56 = arith.constant 0 : index
    %c0_57 = arith.constant 0 : index
    %c0_58 = arith.constant 0 : index
    %46 = vector.load %arg2[%c2_55, %c0_56, %c0_57, %c0_58] : memref<3x3x3x64xf32, #tpu.memory_space<vmem>>, vector<1x1x3x64xf32>
    %47 = vector.shape_cast %46 : vector<1x1x3x64xf32> to vector<3x64xf32>
    %cst_59 = arith.constant dense<0.000000e+00> : vector<256x64xf32>
    %48 = tpu.matmul %45, %47, %cst_59 {dimension_numbers = #tpu.dot_dimension_numbers<[1], [0], [0], [1], [0, 0, 1, 1], [], []>} : vector<256x3xf32>, vector<3x64xf32>, vector<256x64xf32> -> vector<256x64xf32>
    %49 = arith.addf %42, %48 : vector<256x64xf32>
    %c0_60 = arith.constant 0 : index
    %c2_61 = arith.constant 2 : index
    %c1_62 = arith.constant 1 : index
    %c0_63 = arith.constant 0 : index
    %50 = vector.load %arg1[%c0_60, %c2_61, %c1_62, %c0_63] : memref<1x18x18x3xf32, #tpu.memory_space<vmem>>, vector<1x16x16x3xf32>
    %51 = vector.shape_cast %50 : vector<1x16x16x3xf32> to vector<16x16x3xf32>
    %52 = vector.shape_cast %51 : vector<16x16x3xf32> to vector<256x3xf32>
    %c2_64 = arith.constant 2 : index
    %c1_65 = arith.constant 1 : index
    %c0_66 = arith.constant 0 : index
    %c0_67 = arith.constant 0 : index
    %53 = vector.load %arg2[%c2_64, %c1_65, %c0_66, %c0_67] : memref<3x3x3x64xf32, #tpu.memory_space<vmem>>, vector<1x1x3x64xf32>
    %54 = vector.shape_cast %53 : vector<1x1x3x64xf32> to vector<3x64xf32>
    %cst_68 = arith.constant dense<0.000000e+00> : vector<256x64xf32>
    %55 = tpu.matmul %52, %54, %cst_68 {dimension_numbers = #tpu.dot_dimension_numbers<[1], [0], [0], [1], [0, 0, 1, 1], [], []>} : vector<256x3xf32>, vector<3x64xf32>, vector<256x64xf32> -> vector<256x64xf32>
    %56 = arith.addf %49, %55 : vector<256x64xf32>
    %c0_69 = arith.constant 0 : index
    %c2_70 = arith.constant 2 : index
    %c2_71 = arith.constant 2 : index
    %c0_72 = arith.constant 0 : index
    %57 = vector.load %arg1[%c0_69, %c2_70, %c2_71, %c0_72] : memref<1x18x18x3xf32, #tpu.memory_space<vmem>>, vector<1x16x16x3xf32>
    %58 = vector.shape_cast %57 : vector<1x16x16x3xf32> to vector<16x16x3xf32>
    %59 = vector.shape_cast %58 : vector<16x16x3xf32> to vector<256x3xf32>
    %c2_73 = arith.constant 2 : index
    %c2_74 = arith.constant 2 : index
    %c0_75 = arith.constant 0 : index
    %c0_76 = arith.constant 0 : index
    %60 = vector.load %arg2[%c2_73, %c2_74, %c0_75, %c0_76] : memref<3x3x3x64xf32, #tpu.memory_space<vmem>>, vector<1x1x3x64xf32>
    %61 = vector.shape_cast %60 : vector<1x1x3x64xf32> to vector<3x64xf32>
    %cst_77 = arith.constant dense<0.000000e+00> : vector<256x64xf32>
    %62 = tpu.matmul %59, %61, %cst_77 {dimension_numbers = #tpu.dot_dimension_numbers<[1], [0], [0], [1], [0, 0, 1, 1], [], []>} : vector<256x3xf32>, vector<3x64xf32>, vector<256x64xf32> -> vector<256x64xf32>
    %63 = arith.addf %56, %62 : vector<256x64xf32>
    %c0_78 = arith.constant 0 : index
    %c0_79 = arith.constant 0 : index
    %64 = vector.load %arg3[%c0_78, %c0_79] : memref<1x64xf32, #tpu.memory_space<vmem>>, vector<1x64xf32>
    %65 = vector.broadcast %64 : vector<1x64xf32> to vector<256x64xf32>
    %66 = arith.addf %63, %65 : vector<256x64xf32>
    %cst_80 = arith.constant 0.000000e+00 : f32
    %67 = vector.broadcast %cst_80 : f32 to vector<256x64xf32>
    %68 = arith.maximumf %66, %67 : vector<256x64xf32>
    %c0_81 = arith.constant 0 : index
    %c0_82 = arith.constant 0 : index
    %c0_83 = arith.constant 0 : index
    %69 = vector.load %arg4[%c0_81, %c0_82, %c0_83] : memref<1x256x64xf32, #tpu.memory_space<vmem>>, vector<1x256x64xf32>
    %70 = vector.shape_cast %69 : vector<1x256x64xf32> to vector<256x64xf32>
    %71 = vector.shape_cast %68 : vector<256x64xf32> to vector<1x256x64xf32>
    tpu.vector_store %arg4[%c0_81, %c0_82, %c0_83], %71 {strides = array<i32>} : memref<1x256x64xf32, #tpu.memory_space<vmem>>, vector<1x256x64xf32>,
    return
  }
  func.func @transform_0(%arg0: i32) -> (i32, i32, i32, i32) {
    %c0_i32 = arith.constant 0 : i32
    %c0_i32_0 = arith.constant 0 : i32
    %c0_i32_1 = arith.constant 0 : i32
    %c0_i32_2 = arith.constant 0 : i32
    return %arg0, %c0_i32, %c0_i32_0, %c0_i32_1 : i32, i32, i32, i32
  }
  func.func @transform_1(%arg0: i32) -> (i32, i32, i32, i32) {
    %c0_i32 = arith.constant 0 : i32
    %c0_i32_0 = arith.constant 0 : i32
    %c0_i32_1 = arith.constant 0 : i32
    %c0_i32_2 = arith.constant 0 : i32
    %c0_i32_3 = arith.constant 0 : i32
    return %c0_i32, %c0_i32_0, %c0_i32_1, %c0_i32_2 : i32, i32, i32, i32
  }
  func.func @transform_2(%arg0: i32) -> (i32, i32) {
    %c0_i32 = arith.constant 0 : i32
    %c0_i32_0 = arith.constant 0 : i32
    %c0_i32_1 = arith.constant 0 : i32
    return %c0_i32, %c0_i32_0 : i32, i32
  }
  func.func @transform_3(%arg0: i32) -> (i32, i32, i32) {
    %c0_i32 = arith.constant 0 : i32
    %c0_i32_0 = arith.constant 0 : i32
    %c0_i32_1 = arith.constant 0 : i32
    return %arg0, %c0_i32, %c0_i32_0 : i32, i32, i32
  }
}

</mosaic_0001>

<bundles_post_ra>
// kernel: tpu_custom_call.1
= control target key start
LH: loop header
LB: loop body
LE: loop exit
PB: predicated region body
PF: predicated region fallthrough
CT: control target
= control target key end

     0   :  { %s5330_s12 = smov 0   ;;  %s6393_s0 = inlined_call_operand.vmem [shape: f32[2,18,18,3], index: 0, kind: input, shape index: {}]   ;;  %s6394_s1 = inlined_call_operand.vmem [shape: f32[3,3,3,64], index: 1, kind: input, shape index: {}]   ;;  %s6395_s2 = inlined_call_operand.vmem [shape: f32[1,64], index: 2, kind: input, shape index: {}]   ;;  %s6396_s3 = inlined_call_operand.vmem [shape: f32[2,256,64], index: 3, kind: output, shape index: {}]  }
   0x1 LB: > { %s3779_s13 = sadd.s32 4294967295, %s5308_s12   ;;  %p3783_p0 = scmp.ge.s32.totalorder %s5308_s12, 1  ;;  %s5308_s12 = sphi %s5330_s12, %s13_s12  }
   0x2   : > { %p137_p1 = scmp.lt.s32.totalorder %s5308_s12, 3 }
   0x4   : > { %p138_p2 = pnand %p3783_p0, %p137_p1 }
   0x6   : > { %141 = sbr.rel (%p138_p2) target bundleno = 525 (0x20d), region = 32 }
   0xd   : > { %v3787_v0 = vld [vmem:[%s6394_s1 + $0x4] sm:$0x7]  ;;  %vm335_vm0 = vcmask 1042432   ;;  %v5344_v1 = vld [vmem:[%s6394_s1 + $0x10] sm:$0x7]  ;;  %p161_p3 = scmp.lt.s32.totalorder %s3779_s13, 1 }
   0xe   : > { %4585 = vmatprep.subr.msk.mxu1 %vm335_vm0, %v3787_v0  ;;  %4785 = vmatprep.subr.msk.mxu0 %vm335_vm0, %v5344_v1  ;;  %v203_v2 = vld [vmem:[%s6394_s1] sm:$0x7]  ;;  %v4052_v3 = vld [vmem:[%s6394_s1 + $0x14] sm:$0x7]  ;;  %vm238_vm1 = vcmask 23552   ;;  %vm3691_vm2 = vcmask 523264  }
   0xf   : > { %4586 = vmatpush3.msk.msra.mxu1 %vm335_vm0, %v3787_v0  ;;  %4786 = vmatpush3.msk.msra.mxu0 %vm335_vm0, %v5344_v1  ;;  %s6507_s13 = smov (!%p161_p3, %s3779_s13), 1  ;;  %v4118_v9 = vld [vmem:[%s6394_s1 + $0x18] sm:$0x7]  ;;  %v5385_v10 = vld [vmem:[%s6394_s1 + $0x8] sm:$0x7] }
  0x10   : > { %4635 = vmatprep.subr.msk.mxu1 %vm335_vm0, %v203_v2  ;;  %4835 = vmatprep.subr.msk.mxu0 %vm335_vm0, %v4052_v3  ;;  %s5293_s22 = smul.u32 432, %s6507_s13  ;;  %v5504_v28 = vld [vmem:[%s6394_s1 + $0x1c] sm:$0x7]  ;;  %v5667_v61 = vld [vmem:[%s6394_s1 + $0xc] sm:$0x7]  ;;  %s4287_s11 = sshll.u32 %s6507_s13, 8 }
  0x11   : > { %s6289_s16 = scalar_lea.vmem %s6396_s3, %s4287_s11 }
  0x12   : > { %s5366_s25 = scalar_lea.vmem %s6393_s0, %s5293_s22 }
  0x13   : > { %v204_v4 = vld [vmem:[%s5366_s25 + $0x1] sm:$0xff]  ;;  %v3954_v5 = vld [vmem:[%s5366_s25 + $0x19] sm:$0xff]  ;;  %v205_v6 = vld [vmem:[%s5366_s25 + $0x9] sm:$0xff] }
  0x14   : > { %4587 = vmatprep.mubr.msk.f32.mxu1 %vm238_vm1, %v204_v4  ;;  %4787 = vmatprep.mubr.msk.f32.mxu0 %vm238_vm1, %v3954_v5  ;;  %v3955_v7 = vld [vmem:[%s5366_s25 + $0x21] sm:$0xff]  ;;  %v5375_v8 = vld [vmem:[%s5366_s25 + $0x31] sm:$0xff]  ;;  %v5390_v11 = vld [vmem:[%s5366_s25 + $0x39] sm:$0xff] }
  0x15   : > { %4588 = vmatmul.mubr.msk.f32.vlgmr.msra.gmra.mrb[0].mxu1 %vm238_vm1, %v205_v6  ;;  %4788 = vmatmul.mubr.msk.f32.vlgmr.msra.gmra.mrb[0].mxu0 %vm238_vm1, %v3955_v7  ;;  %v5396_v12 = vld [vmem:[%s5366_s25 + $0x49] sm:$0xff]  ;;  %v5409_v13 = vld [vmem:[%s5366_s25 + $0x51] sm:$0xff]  ;;  %v5412_v14 = vld [vmem:[%s5366_s25 + $0x61] sm:$0xff] }
  0x16   : > { %4636 = vmatpush3.msk.msra.mxu1 %vm335_vm0, %v203_v2  ;;  %4836 = vmatpush3.msk.msra.mxu0 %vm335_vm0, %v4052_v3  ;;  %v5423_v15 = vld [vmem:[%s5366_s25 + $0x69] sm:$0xff]  ;;  %v5426_v16 = vld [vmem:[%s5366_s25 + $0x79] sm:$0xff]  ;;  %v5437_v17 = vld [vmem:[%s5366_s25 + $0x81] sm:$0xff] }
  0x17   : > { %4590 = vmatprep.mubr.msk.f32.mxu1 %vm238_vm1, %v3954_v5  ;;  %4790 = vmatprep.mubr.msk.f32.mxu0 %vm238_vm1, %v5375_v8  ;;  %v5440_v18 = vld [vmem:[%s5366_s25 + $0x91] sm:$0xff]  ;;  %v5451_v19 = vld [vmem:[%s5366_s25 + $0x99] sm:$0xff]  ;;  %v5454_v20 = vld [vmem:[%s5366_s25 + $0xa9] sm:$0xff] }
  0x18   : > { %4885 = vmatprep.subr.msk.mxu0 %vm335_vm0, %v4118_v9  ;;  %4685 = vmatprep.subr.msk.mxu1 %vm335_vm0, %v5385_v10  ;;  %v5465_v21 = vld [vmem:[%s5366_s25 + $0xb1] sm:$0xff]  ;;  %v5468_v22 = vld [vmem:[%s5366_s25 + $0xc1] sm:$0xff]  ;;  %v5479_v23 = vld [vmem:[%s5366_s25 + $0xc9] sm:$0xff] }
  0x19   : > { %4591 = vmatmul.mubr.msk.f32.gmra.mrb[2].mxu1 %vm238_vm1, %v3955_v7  ;;  %4791 = vmatmul.mubr.msk.f32.gmra.mrb[2].mxu0 %vm238_vm1, %v5390_v11  ;;  %v5482_v24 = vld [vmem:[%s5366_s25 + $0x1a] sm:$0xff]  ;;  %v5493_v25 = vld [vmem:[%s5366_s25 + $0x22] sm:$0xff]  ;;  %v5499_v27 = vld [vmem:[%s5366_s25 + $0x32] sm:$0xff] }
  0x1a   : > { %4593 = vmatprep.mubr.msk.f32.mxu1 %vm238_vm1, %v5375_v8  ;;  %4793 = vmatprep.mubr.msk.f32.mxu0 %vm238_vm1, %v5396_v12  ;;  %v5496_v26 = vld [vmem:[%s5366_s25 + $0xd9] sm:$0xff]  ;;  %v5514_v29 = vld [vmem:[%s5366_s25 + $0xe1] sm:$0xff]  ;;  %v5522_v31 = vld [vmem:[%s5366_s25 + $0xf1] sm:$0xff] }
  0x1b   : > { %6442 = vst [vmem:[#allocation2_spill] sm:$0xff] %v5514_v29  ;;  %v5517_v30 = vld [vmem:[%s5366_s25 + $0x3a] sm:$0xff]  ;;  %6443 = vst [vmem:[#allocation3_spill] sm:$0xff] %v5522_v31  ;;  %v5525_v32 = vld [vmem:[%s5366_s25 + $0x4a] sm:$0xff] }
  0x1c   : > { %v5538_v33 = vld [vmem:[%s5366_s25 + $0xf9] sm:$0xff]  ;;  %v5544_v35 = vld [vmem:[%s5366_s25 + $0x109] sm:$0xff]  ;;  %v5558_v37 = vld [vmem:[%s5366_s25 + $0x111] sm:$0xff] }
  0x1d   : > { %4594 = vmatmul.mubr.msk.f32.gmra.mrb[4].mxu1 %vm238_vm1, %v5390_v11  ;;  %4794 = vmatmul.mubr.msk.f32.gmra.mrb[4].mxu0 %vm238_vm1, %v5409_v13  ;;  %6444 = vst [vmem:[#allocation4_spill] sm:$0xff] %v5538_v33  ;;  %v5541_v34 = vld [vmem:[%s5366_s25 + $0x52] sm:$0xff]  ;;  %6445 = vst [vmem:[#allocation5_spill] sm:$0xff] %v5544_v35  ;;  %v5547_v36 = vld [vmem:[%s5366_s25 + $0x62] sm:$0xff] }
  0x1e   : > { %4596 = vmatprep.mubr.msk.f32.mxu1 %vm238_vm1, %v5396_v12  ;;  %4796 = vmatprep.mubr.msk.f32.mxu0 %vm238_vm1, %v5412_v14  ;;  %6446 = vst [vmem:[#allocation6_spill] sm:$0xff] %v5558_v37  ;;  %v5561_v38 = vld [vmem:[%s5366_s25 + $0x6a] sm:$0xff]  ;;  %v5564_v39 = vld [vmem:[%s5366_s25 + $0x121] sm:$0xff]  ;;  %v5584_v43 = vld [vmem:[%s5366_s25 + $0x139] sm:$0xff] }
  0x1f   : > { %6447 = vst [vmem:[#allocation7_spill] sm:$0xff] %v5564_v39  ;;  %v5567_v40 = vld [vmem:[%s5366_s25 + $0x7a] sm:$0xff]  ;;  %v5578_v41 = vld [vmem:[%s5366_s25 + $0x129] sm:$0xff]  ;;  %6449 = vst [vmem:[#allocation9_spill] sm:$0xff] %v5584_v43 }
  0x20   : > { %6448 = vst [vmem:[#allocation8_spill] sm:$0xff] %v5578_v41  ;;  %v5581_v42 = vld [vmem:[%s5366_s25 + $0x82] sm:$0xff]  ;;  %v5587_v44 = vld [vmem:[%s5366_s25 + $0x92] sm:$0xff]  ;;  %v5601_v46 = vld [vmem:[%s5366_s25 + $0x9a] sm:$0xff] }
  0x21   : > { %4597 = vmatmul.mubr.msk.f32.gmra.mrb[6].mxu1 %vm238_vm1, %v5409_v13  ;;  %4797 = vmatmul.mubr.msk.f32.gmra.mrb[6].mxu0 %vm238_vm1, %v5423_v15  ;;  %v5598_v45 = vld [vmem:[%s5366_s25 + $0x141] sm:$0xff]  ;;  %v5604_v47 = vld [vmem:[%s5366_s25 + $0x151] sm:$0xff]  ;;  %v5618_v49 = vld [vmem:[%s5366_s25 + $0x159] sm:$0xff] }
  0x22   : > { %4599 = vmatprep.mubr.msk.f32.mxu1 %vm238_vm1, %v5412_v14  ;;  %4799 = vmatprep.mubr.msk.f32.mxu0 %vm238_vm1, %v5426_v16  ;;  %6450 = vst [vmem:[#allocation10_spill] sm:$0xff] %v5598_v45  ;;  %6451 = vst [vmem:[#allocation11_spill] sm:$0xff] %v5604_v47  ;;  %v5607_v48 = vld [vmem:[%s5366_s25 + $0xaa] sm:$0xff]  ;;  %v5621_v50 = vld [vmem:[%s5366_s25 + $0xb2] sm:$0xff] }
  0x23   : > { %6452 = vst [vmem:[#allocation12_spill] sm:$0xff] %v5618_v49  ;;  %v5624_v51 = vld [vmem:[%s5366_s25 + $0x169] sm:$0xff]  ;;  %v5638_v53 = vld [vmem:[%s5366_s25 + $0x171] sm:$0xff]  ;;  %v171_v55 = vld [vmem:[%s5366_s25] sm:$0xff] }
  0x24   : > { %6453 = vst [vmem:[#allocation13_spill] sm:$0xff] %v5624_v51  ;;  %v5627_v52 = vld [vmem:[%s5366_s25 + $0xc2] sm:$0xff]  ;;  %6454 = vst [vmem:[#allocation14_spill] sm:$0xff] %v5638_v53  ;;  %v5641_v54 = vld [vmem:[%s5366_s25 + $0xca] sm:$0xff] }
  0x25   : > { %4600 = vmatmul.mubr.msk.f32.gmra.mrb[8].mxu1 %vm238_vm1, %v5423_v15  ;;  %4800 = vmatmul.mubr.msk.f32.gmra.mrb[8].mxu0 %vm238_vm1, %v5437_v17  ;;  %v5645_v56 = vld [vmem:[%s5366_s25 + $0xda] sm:$0xff]  ;;  %v172_v57 = vld [vmem:[%s5366_s25 + $0x8] sm:$0xff]  ;;  %v5662_v60 = vld [vmem:[%s5366_s25 + $0xf2] sm:$0xff] }
  0x26   : > { %4602 = vmatprep.mubr.msk.f32.mxu1 %vm238_vm1, %v5426_v16  ;;  %4802 = vmatprep.mubr.msk.f32.mxu0 %vm238_vm1, %v5440_v18  ;;  %v5656_v58 = vld [vmem:[%s5366_s25 + $0xe2] sm:$0xff]  ;;  %v5659_v59 = vld [vmem:[%s5366_s25 + $0x18] sm:$0xff]  ;;  %v5685_v0 = vld [vmem:[%s5366_s25 + $0x30] sm:$0xff] }
  0x27   : > { %6455 = vst [vmem:[#allocation15_spill] sm:$0xff] %v5659_v59  ;;  %v5677_v62 = vld [vmem:[%s5366_s25 + $0x20] sm:$0xff]  ;;  %6457 = vst [vmem:[#allocation17_spill] sm:$0xff] %v5685_v0  ;;  %v5688_v2 = vld [vmem:[%s5366_s25 + $0x10a] sm:$0xff] }
  0x28   : > { %6456 = vst [vmem:[#allocation16_spill] sm:$0xff] %v5677_v62  ;;  %v5680_v63 = vld [vmem:[%s5366_s25 + $0xfa] sm:$0xff]  ;;  %v5704_v4 = vld [vmem:[%s5366_s25 + $0x112] sm:$0xff]  ;;  %v5707_v5 = vld [vmem:[%s5366_s25 + $0x48] sm:$0xff] }
  0x29   : > { %4603 = vmatmul.mubr.msk.f32.gmra.mrb[10].mxu1 %vm238_vm1, %v5437_v17  ;;  %4803 = vmatmul.mubr.msk.f32.gmra.mrb[10].mxu0 %vm238_vm1, %v5451_v19  ;;  %v5701_v3 = vld [vmem:[%s5366_s25 + $0x38] sm:$0xff]  ;;  %6459 = vst [vmem:[#allocation19_spill] sm:$0xff] %v5707_v5  ;;  %v5710_v6 = vld [vmem:[%s5366_s25 + $0x122] sm:$0xff]  ;;  %v5721_v7 = vld [vmem:[%s5366_s25 + $0x50] sm:$0xff] }
  0x2a   : > { %4605 = vmatprep.mubr.msk.f32.mxu1 %vm238_vm1, %v5440_v18  ;;  %4805 = vmatprep.mubr.msk.f32.mxu0 %vm238_vm1, %v5454_v20  ;;  %6458 = vst [vmem:[#allocation18_spill] sm:$0xff] %v5701_v3  ;;  %6460 = vst [vmem:[#allocation20_spill] sm:$0xff] %v5721_v7 }
  0x2d   : > { %4606 = vmatmul.mubr.msk.f32.gmra.mrb[12].mxu1 %vm238_vm1, %v5451_v19  ;;  %4806 = vmatmul.mubr.msk.f32.gmra.mrb[12].mxu0 %vm238_vm1, %v5465_v21 }
  0x2e   : > { %4608 = vmatprep.mubr.msk.f32.mxu1 %vm238_vm1, %v5454_v20  ;;  %4808 = vmatprep.mubr.msk.f32.mxu0 %vm238_vm1, %v5468_v22 }
  0x31   : > { %4609 = vmatmul.mubr.msk.f32.gmra.mrb[14].mxu1 %vm238_vm1, %v5465_v21  ;;  %4809 = vmatmul.mubr.msk.f32.gmra.mrb[14].mxu0 %vm238_vm1, %v5479_v23 }
  0x32   : > { %4611 = vmatprep.mubr.msk.f32.mxu1 %vm238_vm1, %v5468_v22  ;;  %4837 = vmatprep.mubr.msk.f32.mxu0 %vm238_vm1, %v5482_v24 }
  0x35   : > { %4612 = vmatmul.mubr.msk.f32.gmra.mrb[16].mxu1 %vm238_vm1, %v5479_v23  ;;  %4838 = vmatmul.mubr.msk.f32.vlgmr.msra.gmra.mrb[0].mxu0 %vm238_vm1, %v5493_v25 }
  0x36   : > { %4886 = vmatpush3.msk.msra.mxu0 %vm335_vm0, %v4118_v9  ;;  %4614 = vmatprep.mubr.msk.f32.mxu1 %vm238_vm1, %v5496_v26  ;;  %v5724_v9 = vld [vmem:[%s5366_s25 + $0x12a] sm:$0xff] }
  0x37   : > { %4840 = vmatprep.mubr.msk.f32.mxu0 %vm238_vm1, %v5499_v27  ;;  %4935 = vmatprep.subr.msk.mxu0 %vm335_vm0, %v5504_v28 }
  0x39   : > { %4615 = vmatmul.mubr.msk.f32.gmra.mrb[18].mxu1 %vm238_vm1, %v5514_v29  ;;  %4841 = vmatmul.mubr.msk.f32.gmra.mrb[2].mxu0 %vm238_vm1, %v5517_v30  ;;  %v5821_v29 = vld [vmem:[%s5366_s25 + $0xd8] sm:$0xff] }
  0x3a   : > { %4617 = vmatprep.mubr.msk.f32.mxu1 %vm238_vm1, %v5522_v31  ;;  %4843 = vmatprep.mubr.msk.f32.mxu0 %vm238_vm1, %v5525_v32  ;;  %v5804_v31 = vld [vmem:[%s5366_s25 + $0x18a] sm:$0xff] }
  0x3b   : > { %6471 = vst [vmem:[#allocation31_spill] sm:$0xff] %v5804_v31 }
  0x3d   : > { %4618 = vmatmul.mubr.msk.f32.gmra.mrb[20].mxu1 %vm238_vm1, %v5538_v33  ;;  %4844 = vmatmul.mubr.msk.f32.gmra.mrb[4].mxu0 %vm238_vm1, %v5541_v34  ;;  %v5790_v33 = vld [vmem:[%s5366_s25 + $0x182] sm:$0xff] }
  0x3e   : > { %4620 = vmatprep.mubr.msk.f32.mxu1 %vm238_vm1, %v5544_v35  ;;  %4846 = vmatprep.mubr.msk.f32.mxu0 %vm238_vm1, %v5547_v36  ;;  %v5787_v35 = vld [vmem:[%s5366_s25 + $0xa8] sm:$0xff]  ;;  %6469 = vst [vmem:[#allocation29_spill] sm:$0xff] %v5790_v33 }
  0x3f   : > { %6468 = vst [vmem:[#allocation28_spill] sm:$0xff] %v5787_v35 }
  0x41   : > { %4621 = vmatmul.mubr.msk.f32.gmra.mrb[22].mxu1 %vm238_vm1, %v5558_v37  ;;  %4847 = vmatmul.mubr.msk.f32.gmra.mrb[6].mxu0 %vm238_vm1, %v5561_v38  ;;  %v5784_v37 = vld [vmem:[%s5366_s25 + $0x172] sm:$0xff] }
  0x42   : > { %4623 = vmatprep.mubr.msk.f32.mxu1 %vm238_vm1, %v5564_v39  ;;  %4849 = vmatprep.mubr.msk.f32.mxu0 %vm238_vm1, %v5567_v40  ;;  %v5781_v39 = vld [vmem:[%s5366_s25 + $0x98] sm:$0xff]  ;;  %6467 = vst [vmem:[#allocation27_spill] sm:$0xff] %v5784_v37 }
  0x43   : > { %6466 = vst [vmem:[#allocation26_spill] sm:$0xff] %v5781_v39 }
  0x45   : > { %4624 = vmatmul.mubr.msk.f32.gmra.mrb[24].mxu1 %vm238_vm1, %v5578_v41  ;;  %4850 = vmatmul.mubr.msk.f32.gmra.mrb[8].mxu0 %vm238_vm1, %v5581_v42  ;;  %v5770_v41 = vld [vmem:[%s5366_s25 + $0x16a] sm:$0xff] }
  0x46   : > { %4626 = vmatprep.mubr.msk.f32.mxu1 %vm238_vm1, %v5584_v43  ;;  %4852 = vmatprep.mubr.msk.f32.mxu0 %vm238_vm1, %v5587_v44  ;;  %v5767_v43 = vld [vmem:[%s5366_s25 + $0x90] sm:$0xff] }
  0x47   : > { %6465 = vst [vmem:[#allocation25_spill] sm:$0xff] %v5767_v43 }
  0x49   : > { %4627 = vmatmul.mubr.msk.f32.gmra.mrb[26].mxu1 %vm238_vm1, %v5598_v45  ;;  %4853 = vmatmul.mubr.msk.f32.gmra.mrb[10].mxu0 %vm238_vm1, %v5601_v46  ;;  %v5764_v45 = vld [vmem:[%s5366_s25 + $0x15a] sm:$0xff] }
  0x4a   : > { %4629 = vmatprep.mubr.msk.f32.mxu1 %vm238_vm1, %v5604_v47  ;;  %4855 = vmatprep.mubr.msk.f32.mxu0 %vm238_vm1, %v5607_v48  ;;  %v5761_v47 = vld [vmem:[%s5366_s25 + $0x80] sm:$0xff] }
  0x4b   : > { %6464 = vst [vmem:[#allocation24_spill] sm:$0xff] %v5761_v47 }
  0x4d   : > { %4630 = vmatmul.mubr.msk.f32.gmra.mrb[28].mxu1 %vm238_vm1, %v5618_v49  ;;  %4856 = vmatmul.mubr.msk.f32.gmra.mrb[12].mxu0 %vm238_vm1, %v5621_v50  ;;  %v5750_v49 = vld [vmem:[%s5366_s25 + $0x152] sm:$0xff] }
  0x4e   : > { %4632 = vmatprep.mubr.msk.f32.mxu1 %vm238_vm1, %v5624_v51  ;;  %4858 = vmatprep.mubr.msk.f32.mxu0 %vm238_vm1, %v5627_v52  ;;  %v5747_v51 = vld [vmem:[%s5366_s25 + $0x78] sm:$0xff] }
  0x4f   : > { %6463 = vst [vmem:[#allocation23_spill] sm:$0xff] %v5747_v51 }
  0x51   : > { %4633 = vmatmul.mubr.msk.f32.gmra.mrb[30].mxu1 %vm238_vm1, %v5638_v53  ;;  %4859 = vmatmul.mubr.msk.f32.gmra.mrb[14].mxu0 %vm238_vm1, %v5641_v54  ;;  %v5744_v53 = vld [vmem:[%s5366_s25 + $0x142] sm:$0xff] }
  0x52   : > { %4637 = vmatprep.mubr.msk.f32.mxu1 %vm238_vm1, %v171_v55  ;;  %4861 = vmatprep.mubr.msk.f32.mxu0 %vm238_vm1, %v5645_v56  ;;  %v5730_v55 = vld [vmem:[%s5366_s25 + $0x13a] sm:$0xff] }
  0x55   : > { %4638 = vmatmul.mubr.msk.f32.vlgmr.msra.gmra.mrb[0].mxu1 %vm238_vm1, %v172_v57  ;;  %4862 = vmatmul.mubr.msk.f32.gmra.mrb[16].mxu0 %vm238_vm1, %v5656_v58  ;;  %v5741_v57 = vld [vmem:[%s5366_s25 + $0x68] sm:$0xff] }
  0x56   : > { %4686 = vmatpush3.msk.msra.mxu1 %vm335_vm0, %v5385_v10  ;;  %4640 = vmatprep.mubr.msk.f32.mxu1 %vm238_vm1, %v5659_v59  ;;  %v5727_v10 = vld [vmem:[%s5366_s25 + $0x60] sm:$0xff]  ;;  %6462 = vst [vmem:[#allocation22_spill] sm:$0xff] %v5741_v57 }
  0x57   : > { %4864 = vmatprep.mubr.msk.f32.mxu0 %vm238_vm1, %v5662_v60  ;;  %4735 = vmatprep.subr.msk.mxu1 %vm335_vm0, %v5667_v61  ;;  %6461 = vst [vmem:[#allocation21_spill] sm:$0xff] %v5727_v10  ;;  %v5807_v59 = vld [vmem:[%s5366_s25 + $0xc0] sm:$0xff] }
  0x59   : > { %4641 = vmatmul.mubr.msk.f32.gmra.mrb[2].mxu1 %vm238_vm1, %v5677_v62  ;;  %4865 = vmatmul.mubr.msk.f32.gmra.mrb[18].mxu0 %vm238_vm1, %v5680_v63  ;;  %v5801_v62 = vld [vmem:[%s5366_s25 + $0xb0] sm:$0xff] }
  0x5a   : > { %4643 = vmatprep.mubr.msk.f32.mxu1 %vm238_vm1, %v5685_v0  ;;  %4867 = vmatprep.mubr.msk.f32.mxu0 %vm238_vm1, %v5688_v2  ;;  %6470 = vst [vmem:[#allocation30_spill] sm:$0xff] %v5801_v62 }
  0x5d   : > { %4644 = vmatmul.mubr.msk.f32.gmra.mrb[4].mxu1 %vm238_vm1, %v5701_v3  ;;  %4868 = vmatmul.mubr.msk.f32.gmra.mrb[20].mxu0 %vm238_vm1, %v5704_v4 }
  0x5e   : > { %4646 = vmatprep.mubr.msk.f32.mxu1 %vm238_vm1, %v5707_v5  ;;  %4870 = vmatprep.mubr.msk.f32.mxu0 %vm238_vm1, %v5710_v6 }
  0x61   : > { %4647 = vmatmul.mubr.msk.f32.gmra.mrb[6].mxu1 %vm238_vm1, %v5721_v7  ;;  %4871 = vmatmul.mubr.msk.f32.gmra.mrb[22].mxu0 %vm238_vm1, %v5724_v9 }
  0x62   : > { %4649 = vmatprep.mubr.msk.f32.mxu1 %vm238_vm1, %v5727_v10  ;;  %4873 = vmatprep.mubr.msk.f32.mxu0 %vm238_vm1, %v5730_v55 }
  0x65   : > { %4650 = vmatmul.mubr.msk.f32.gmra.mrb[8].mxu1 %vm238_vm1, %v5741_v57  ;;  %4874 = vmatmul.mubr.msk.f32.gmra.mrb[24].mxu0 %vm238_vm1, %v5744_v53 }
  0x66   : > { %4652 = vmatprep.mubr.msk.f32.mxu1 %vm238_vm1, %v5747_v51  ;;  %4876 = vmatprep.mubr.msk.f32.mxu0 %vm238_vm1, %v5750_v49 }
  0x69   : > { %4653 = vmatmul.mubr.msk.f32.gmra.mrb[10].mxu1 %vm238_vm1, %v5761_v47  ;;  %4877 = vmatmul.mubr.msk.f32.gmra.mrb[26].mxu0 %vm238_vm1, %v5764_v45 }
  0x6a   : > { %4655 = vmatprep.mubr.msk.f32.mxu1 %vm238_vm1, %v5767_v43  ;;  %4879 = vmatprep.mubr.msk.f32.mxu0 %vm238_vm1, %v5770_v41 }
  0x6d   : > { %4656 = vmatmul.mubr.msk.f32.gmra.mrb[12].mxu1 %vm238_vm1, %v5781_v39  ;;  %4880 = vmatmul.mubr.msk.f32.gmra.mrb[28].mxu0 %vm238_vm1, %v5784_v37  ;;  %v5826_v37 = vld [vmem:[%s6394_s1 + $0x20] sm:$0x7] }
  0x6e   : > { %4658 = vmatprep.mubr.msk.f32.mxu1 %vm238_vm1, %v5787_v35  ;;  %4882 = vmatprep.mubr.msk.f32.mxu0 %vm238_vm1, %v5790_v33  ;;  %v5818_v33 = vld [vmem:[%s5366_s25 + $0xc8] sm:$0xff] }
  0x6f   : > { %6472 = vst [vmem:[#allocation32_spill] sm:$0xff] %v5818_v33 }
  0x71   : > { %4659 = vmatmul.mubr.msk.f32.gmra.mrb[14].mxu1 %vm238_vm1, %v5801_v62  ;;  %4883 = vmatmul.mubr.msk.f32.gmra.mrb[30].mxu0 %vm238_vm1, %v5804_v31  ;;  %v5837_v31 = vld [vmem:[%s5366_s25 + $0xe0] sm:$0xff] }
  0x72   : > { %4661 = vmatprep.mubr.msk.f32.mxu1 %vm238_vm1, %v5807_v59  ;;  %4887 = vmatprep.mubr.msk.f32.mxu0 %vm238_vm1, %v5685_v0  ;;  %v5842_v0 = vld [vmem:[%s5366_s25 + $0xf0] sm:$0xff] }
  0x75   : > { %4662 = vmatmul.mubr.msk.f32.gmra.mrb[16].mxu1 %vm238_vm1, %v5818_v33  ;;  %4888 = vmatmul.mubr.msk.f32.vlgmr.msra.gmra.mrb[0].mxu0 %vm238_vm1, %v5701_v3  ;;  %v888_v3 = vld [vmem:[%s5366_s25 + $0x2] sm:$0xff] }
  0x76   : > { %4936 = vmatpush3.msk.msra.mxu0 %vm335_vm0, %v5504_v28  ;;  %4664 = vmatprep.mubr.msk.f32.mxu1 %vm238_vm1, %v5821_v29  ;;  %v5855_v28 = vld [vmem:[%s5366_s25 + $0xf8] sm:$0xff] }
  0x77   : > { %4890 = vmatprep.mubr.msk.f32.mxu0 %vm238_vm1, %v5707_v5  ;;  %4985 = vmatprep.subr.msk.mxu0 %vm335_vm0, %v5826_v37  ;;  %v5858_v5 = vld [vmem:[%s5366_s25 + $0x108] sm:$0xff] }
  0x79   : > { %4665 = vmatmul.mubr.msk.f32.gmra.mrb[18].mxu1 %vm238_vm1, %v5837_v31  ;;  %4891 = vmatmul.mubr.msk.f32.gmra.mrb[2].mxu0 %vm238_vm1, %v5721_v7  ;;  %v5869_v7 = vld [vmem:[%s5366_s25 + $0x110] sm:$0xff] }
  0x7a   : > { %4667 = vmatprep.mubr.msk.f32.mxu1 %vm238_vm1, %v5842_v0  ;;  %4893 = vmatprep.mubr.msk.f32.mxu0 %vm238_vm1, %v5727_v10  ;;  %v5872_v10 = vld [vmem:[%s5366_s25 + $0x120] sm:$0xff] }
  0x7d   : > { %4668 = vmatmul.mubr.msk.f32.gmra.mrb[20].mxu1 %vm238_vm1, %v5855_v28  ;;  %4894 = vmatmul.mubr.msk.f32.gmra.mrb[4].mxu0 %vm238_vm1, %v5741_v57  ;;  %v5883_v57 = vld [vmem:[%s5366_s25 + $0x128] sm:$0xff] }
  0x7e   : > { %4670 = vmatprep.mubr.msk.f32.mxu1 %vm238_vm1, %v5858_v5  ;;  %4896 = vmatprep.mubr.msk.f32.mxu0 %vm238_vm1, %v5747_v51  ;;  %v5886_v51 = vld [vmem:[%s5366_s25 + $0x138] sm:$0xff] }
  0x81   : > { %4671 = vmatmul.mubr.msk.f32.gmra.mrb[22].mxu1 %vm238_vm1, %v5869_v7  ;;  %4897 = vmatmul.mubr.msk.f32.gmra.mrb[6].mxu0 %vm238_vm1, %v5761_v47  ;;  %v5897_v47 = vld [vmem:[%s5366_s25 + $0x140] sm:$0xff] }
  0x82   : > { %4673 = vmatprep.mubr.msk.f32.mxu1 %vm238_vm1, %v5872_v10  ;;  %4899 = vmatprep.mubr.msk.f32.mxu0 %vm238_vm1, %v5767_v43  ;;  %v5900_v43 = vld [vmem:[%s5366_s25 + $0x150] sm:$0xff] }
  0x85   : > { %4674 = vmatmul.mubr.msk.f32.gmra.mrb[24].mxu1 %vm238_vm1, %v5883_v57  ;;  %4900 = vmatmul.mubr.msk.f32.gmra.mrb[8].mxu0 %vm238_vm1, %v5781_v39  ;;  %v5911_v39 = vld [vmem:[%s5366_s25 + $0x158] sm:$0xff] }
  0x86   : > { %4676 = vmatprep.mubr.msk.f32.mxu1 %vm238_vm1, %v5886_v51  ;;  %4902 = vmatprep.mubr.msk.f32.mxu0 %vm238_vm1, %v5787_v35  ;;  %v5914_v35 = vld [vmem:[%s5366_s25 + $0x168] sm:$0xff] }
  0x89   : > { %4677 = vmatmul.mubr.msk.f32.gmra.mrb[26].mxu1 %vm238_vm1, %v5897_v47  ;;  %4903 = vmatmul.mubr.msk.f32.gmra.mrb[10].mxu0 %vm238_vm1, %v5801_v62  ;;  %v5925_v62 = vld [vmem:[%s5366_s25 + $0x170] sm:$0xff] }
  0x8a   : > { %4679 = vmatprep.mubr.msk.f32.mxu1 %vm238_vm1, %v5900_v43  ;;  %4905 = vmatprep.mubr.msk.f32.mxu0 %vm238_vm1, %v5807_v59 }
  0x8d   : > { %4680 = vmatmul.mubr.msk.f32.gmra.mrb[28].mxu1 %vm238_vm1, %v5911_v39  ;;  %4906 = vmatmul.mubr.msk.f32.gmra.mrb[12].mxu0 %vm238_vm1, %v5818_v33  ;;  %v889_v33 = vld [vmem:[%s5366_s25 + $0xa] sm:$0xff] }
  0x8e   : > { %4682 = vmatprep.mubr.msk.f32.mxu1 %vm238_vm1, %v5914_v35  ;;  %4908 = vmatprep.mubr.msk.f32.mxu0 %vm238_vm1, %v5821_v29 }
  0x91   : > { %4683 = vmatmul.mubr.msk.f32.gmra.mrb[30].mxu1 %vm238_vm1, %v5925_v62  ;;  %4909 = vmatmul.mubr.msk.f32.gmra.mrb[14].mxu0 %vm238_vm1, %v5837_v31 }
  0x92   : > { %4687 = vmatprep.mubr.msk.f32.mxu1 %vm238_vm1, %v888_v3  ;;  %4911 = vmatprep.mubr.msk.f32.mxu0 %vm238_vm1, %v5842_v0  ;;  %v6489_v3 = vld [vmem:[#allocation22_spill] sm:$0xff] }
  0x95   : > { %4688 = vmatmul.mubr.msk.f32.vlgmr.msra.gmra.mrb[0].mxu1 %vm238_vm1, %v889_v33  ;;  %4912 = vmatmul.mubr.msk.f32.gmra.mrb[16].mxu0 %vm238_vm1, %v5855_v28  ;;  %v4116_v33 = vld [vmem:[%s5366_s25 + $0x198] sm:$0xff] }
  0x96   : > { %4736 = vmatpush3.msk.msra.mxu1 %vm335_vm0, %v5667_v61  ;;  %4690 = vmatprep.mubr.msk.f32.mxu1 %vm238_vm1, %v5482_v24  ;;  %v5980_v24 = vld [vmem:[%s5366_s25 + $0x180] sm:$0xff] }
  0x97   : > { %4914 = vmatprep.mubr.msk.f32.mxu0 %vm238_vm1, %v5858_v5  ;;  %5035 = vmatprep.subr.msk.mxu1 %vm335_vm0, %v5344_v1  ;;  %v4117_v61 = vld [vmem:[%s5366_s25 + $0x1a0] sm:$0xff] }
  0x99   : > { %4691 = vmatmul.mubr.msk.f32.gmra.mrb[2].mxu1 %vm238_vm1, %v5493_v25  ;;  %4915 = vmatmul.mubr.msk.f32.gmra.mrb[18].mxu0 %vm238_vm1, %v5869_v7  ;;  %v5991_v25 = vld [vmem:[%s5366_s25 + $0x188] sm:$0xff] }
  0x9a   : > { %4693 = vmatprep.mubr.msk.f32.mxu1 %vm238_vm1, %v5499_v27  ;;  %4917 = vmatprep.mubr.msk.f32.mxu0 %vm238_vm1, %v5872_v10 }
  0x9d   : > { %4694 = vmatmul.mubr.msk.f32.gmra.mrb[4].mxu1 %vm238_vm1, %v5517_v30  ;;  %4918 = vmatmul.mubr.msk.f32.gmra.mrb[20].mxu0 %vm238_vm1, %v5883_v57 }
  0x9e   : > { %4696 = vmatprep.mubr.msk.f32.mxu1 %vm238_vm1, %v5525_v32  ;;  %4920 = vmatprep.mubr.msk.f32.mxu0 %vm238_vm1, %v5886_v51 }
  0xa1   : > { %4697 = vmatmul.mubr.msk.f32.gmra.mrb[6].mxu1 %vm238_vm1, %v5541_v34  ;;  %4921 = vmatmul.mubr.msk.f32.gmra.mrb[22].mxu0 %vm238_vm1, %v5897_v47 }
  0xa2   : > { %4699 = vmatprep.mubr.msk.f32.mxu1 %vm238_vm1, %v5547_v36  ;;  %4923 = vmatprep.mubr.msk.f32.mxu0 %vm238_vm1, %v5900_v43 }
  0xa5   : > { %4700 = vmatmul.mubr.msk.f32.gmra.mrb[8].mxu1 %vm238_vm1, %v5561_v38  ;;  %4924 = vmatmul.mubr.msk.f32.gmra.mrb[24].mxu0 %vm238_vm1, %v5911_v39 }
  0xa6   : > { %4702 = vmatprep.mubr.msk.f32.mxu1 %vm238_vm1, %v5567_v40  ;;  %4926 = vmatprep.mubr.msk.f32.mxu0 %vm238_vm1, %v5914_v35 }
  0xa9   : > { %4703 = vmatmul.mubr.msk.f32.gmra.mrb[10].mxu1 %vm238_vm1, %v5581_v42  ;;  %4927 = vmatmul.mubr.msk.f32.gmra.mrb[26].mxu0 %vm238_vm1, %v5925_v62 }
  0xaa   : > { %4705 = vmatprep.mubr.msk.f32.mxu1 %vm238_vm1, %v5587_v44  ;;  %4929 = vmatprep.mubr.msk.f32.mxu0 %vm238_vm1, %v5980_v24 }
  0xad   : > { %4706 = vmatmul.mubr.msk.f32.gmra.mrb[12].mxu1 %vm238_vm1, %v5601_v46  ;;  %4930 = vmatmul.mubr.msk.f32.gmra.mrb[28].mxu0 %vm238_vm1, %v5991_v25 }
  0xae   : > { %4708 = vmatprep.mubr.msk.f32.mxu1 %vm238_vm1, %v5607_v48  ;;  %4932 = vmatprep.mubr.msk.f32.mxu0 %vm238_vm1, %v4116_v33  ;;  %v6490_v33 = vld [vmem:[#allocation10_spill] sm:$0xff] }
  0xb1   : > { %4709 = vmatmul.mubr.msk.f32.gmra.mrb[14].mxu1 %vm238_vm1, %v5621_v50  ;;  %4933 = vmatmul.mubr.msk.f32.gmra.mrb[30].mxu0 %vm238_vm1, %v4117_v61  ;;  %v6491_v61 = vld [vmem:[#allocation23_spill] sm:$0xff] }
  0xb2   : > { %4711 = vmatprep.mubr.msk.f32.mxu1 %vm238_vm1, %v5627_v52  ;;  %4937 = vmatprep.mubr.msk.f32.mxu0 %vm238_vm1, %v5375_v8  ;;  %v6473_v8 = vld [vmem:[#allocation27_spill] sm:$0xff] }
  0xb5   : > { %4712 = vmatmul.mubr.msk.f32.gmra.mrb[16].mxu1 %vm238_vm1, %v5641_v54  ;;  %4938 = vmatmul.mubr.msk.f32.vlgmr.msra.gmra.mrb[0].mxu0 %vm238_vm1, %v5390_v11  ;;  %v6474_v11 = vld [vmem:[#allocation2_spill] sm:$0xff] }
  0xb6   : > { %4986 = vmatpush3.msk.msra.mxu0 %vm335_vm0, %v5826_v37  ;;  %4714 = vmatprep.mubr.msk.f32.mxu1 %vm238_vm1, %v5645_v56  ;;  %v6488_v37 = vld [vmem:[#allocation9_spill] sm:$0xff] }
  0xb7   : > { %4940 = vmatprep.mubr.msk.f32.mxu0 %vm238_vm1, %v5396_v12  ;;  %v6475_v12 = vld [vmem:[#allocation15_spill] sm:$0xff] }
  0xb9   : > { %4715 = vmatmul.mubr.msk.f32.gmra.mrb[18].mxu1 %vm238_vm1, %v5656_v58  ;;  %4941 = vmatmul.mubr.msk.f32.gmra.mrb[2].mxu0 %vm238_vm1, %v5409_v13  ;;  %v6476_v13 = vld [vmem:[#allocation3_spill] sm:$0xff] }
  0xba   : > { %4717 = vmatprep.mubr.msk.f32.mxu1 %vm238_vm1, %v5662_v60  ;;  %4943 = vmatprep.mubr.msk.f32.mxu0 %vm238_vm1, %v5412_v14  ;;  %v6477_v14 = vld [vmem:[#allocation16_spill] sm:$0xff] }
  0xbd   : > { %4718 = vmatmul.mubr.msk.f32.gmra.mrb[20].mxu1 %vm238_vm1, %v5680_v63  ;;  %4944 = vmatmul.mubr.msk.f32.gmra.mrb[4].mxu0 %vm238_vm1, %v5423_v15  ;;  %v6478_v15 = vld [vmem:[#allocation4_spill] sm:$0xff] }
  0xbe   : > { %4720 = vmatprep.mubr.msk.f32.mxu1 %vm238_vm1, %v5688_v2  ;;  %4946 = vmatprep.mubr.msk.f32.mxu0 %vm238_vm1, %v5426_v16  ;;  %v6479_v16 = vld [vmem:[#allocation17_spill] sm:$0xff] }
  0xc1   : > { %4721 = vmatmul.mubr.msk.f32.gmra.mrb[22].mxu1 %vm238_vm1, %v5704_v4  ;;  %4947 = vmatmul.mubr.msk.f32.gmra.mrb[6].mxu0 %vm238_vm1, %v5437_v17  ;;  %v6480_v17 = vld [vmem:[#allocation5_spill] sm:$0xff] }
  0xc2   : > { %4723 = vmatprep.mubr.msk.f32.mxu1 %vm238_vm1, %v5710_v6  ;;  %4949 = vmatprep.mubr.msk.f32.mxu0 %vm238_vm1, %v5440_v18  ;;  %v6481_v18 = vld [vmem:[#allocation18_spill] sm:$0xff] }
  0xc5   : > { %4724 = vmatmul.mubr.msk.f32.gmra.mrb[24].mxu1 %vm238_vm1, %v5724_v9  ;;  %4950 = vmatmul.mubr.msk.f32.gmra.mrb[8].mxu0 %vm238_vm1, %v5451_v19  ;;  %v6482_v19 = vld [vmem:[#allocation6_spill] sm:$0xff] }
  0xc6   : > { %4726 = vmatprep.mubr.msk.f32.mxu1 %vm238_vm1, %v5730_v55  ;;  %4952 = vmatprep.mubr.msk.f32.mxu0 %vm238_vm1, %v5454_v20  ;;  %v6483_v20 = vld [vmem:[#allocation19_spill] sm:$0xff] }
  0xc9   : > { %4727 = vmatmul.mubr.msk.f32.gmra.mrb[26].mxu1 %vm238_vm1, %v5744_v53  ;;  %4953 = vmatmul.mubr.msk.f32.gmra.mrb[10].mxu0 %vm238_vm1, %v5465_v21  ;;  %v6484_v21 = vld [vmem:[#allocation7_spill] sm:$0xff] }
  0xca   : > { %4729 = vmatprep.mubr.msk.f32.mxu1 %vm238_vm1, %v5750_v49  ;;  %4955 = vmatprep.mubr.msk.f32.mxu0 %vm238_vm1, %v5468_v22  ;;  %v6486_v22 = vld [vmem:[#allocation8_spill] sm:$0xff] }
  0xcd   : > { %4730 = vmatmul.mubr.msk.f32.gmra.mrb[28].mxu1 %vm238_vm1, %v5764_v45  ;;  %4956 = vmatmul.mubr.msk.f32.gmra.mrb[12].mxu0 %vm238_vm1, %v5479_v23  ;;  %v6487_v23 = vld [vmem:[#allocation21_spill] sm:$0xff] }
  0xce   : > { %4732 = vmatprep.mubr.msk.f32.mxu1 %vm238_vm1, %v5770_v41  ;;  %4958 = vmatprep.mubr.msk.f32.mxu0 %vm238_vm1, %v5496_v26 }
  0xd1   : > { %4733 = vmatmul.mubr.msk.f32.gmra.mrb[30].mxu1 %vm238_vm1, %v6473_v8  ;;  %4959 = vmatmul.mubr.msk.f32.gmra.mrb[14].mxu0 %vm238_vm1, %v6474_v11  ;;  %v6500_v8 = vld [vmem:[#allocation30_spill] sm:$0xff] }
  0xd2   : > { %4737 = vmatprep.mubr.msk.f32.mxu1 %vm238_vm1, %v6475_v12  ;;  %4961 = vmatprep.mubr.msk.f32.mxu0 %vm238_vm1, %v6476_v13  ;;  %v6492_v12 = vld [vmem:[#allocation11_spill] sm:$0xff] }
  0xd5   : > { %4738 = vmatmul.mubr.msk.f32.vlgmr.msra.gmra.mrb[0].mxu1 %vm238_vm1, %v6477_v14  ;;  %4962 = vmatmul.mubr.msk.f32.gmra.mrb[16].mxu0 %vm238_vm1, %v6478_v15  ;;  %v6493_v14 = vld [vmem:[#allocation24_spill] sm:$0xff] }
  0xd6   : > { %5036 = vmatpush3.msk.msra.mxu1 %vm335_vm0, %v5344_v1  ;;  %4740 = vmatprep.mubr.msk.f32.mxu1 %vm238_vm1, %v6479_v16  ;;  %v6485_v1 = vld [vmem:[#allocation20_spill] sm:$0xff] }
  0xd7   : > { %4964 = vmatprep.mubr.msk.f32.mxu0 %vm238_vm1, %v6480_v17  ;;  %v6494_v16 = vld [vmem:[#allocation12_spill] sm:$0xff] }
  0xd9   : > { %4741 = vmatmul.mubr.msk.f32.gmra.mrb[2].mxu1 %vm238_vm1, %v6481_v18  ;;  %4965 = vmatmul.mubr.msk.f32.gmra.mrb[18].mxu0 %vm238_vm1, %v6482_v19  ;;  %v6495_v18 = vld [vmem:[#allocation25_spill] sm:$0xff] }
  0xda   : > { %4743 = vmatprep.mubr.msk.f32.mxu1 %vm238_vm1, %v6483_v20  ;;  %4967 = vmatprep.mubr.msk.f32.mxu0 %vm238_vm1, %v6484_v21  ;;  %v6496_v20 = vld [vmem:[#allocation13_spill] sm:$0xff] }
  0xdd   : > { %4744 = vmatmul.mubr.msk.f32.gmra.mrb[4].mxu1 %vm238_vm1, %v6485_v1  ;;  %4968 = vmatmul.mubr.msk.f32.gmra.mrb[20].mxu0 %vm238_vm1, %v6486_v22  ;;  %v6118_v1 = vld [vmem:[%s5366_s25 + $0x181] sm:$0xff] }
  0xde   : > { %4746 = vmatprep.mubr.msk.f32.mxu1 %vm238_vm1, %v6487_v23  ;;  %4970 = vmatprep.mubr.msk.f32.mxu0 %vm238_vm1, %v6488_v37  ;;  %v6497_v23 = vld [vmem:[#allocation26_spill] sm:$0xff] }
  0xe1   : > { %4747 = vmatmul.mubr.msk.f32.gmra.mrb[6].mxu1 %vm238_vm1, %v6489_v3  ;;  %4971 = vmatmul.mubr.msk.f32.gmra.mrb[22].mxu0 %vm238_vm1, %v6490_v33  ;;  %v6498_v3 = vld [vmem:[#allocation14_spill] sm:$0xff] }
  0xe2   : > { %4749 = vmatprep.mubr.msk.f32.mxu1 %vm238_vm1, %v6491_v61  ;;  %4973 = vmatprep.mubr.msk.f32.mxu0 %vm238_vm1, %v6492_v12  ;;  %v6499_v61 = vld [vmem:[#allocation28_spill] sm:$0xff] }
  0xe5   : > { %4750 = vmatmul.mubr.msk.f32.gmra.mrb[8].mxu1 %vm238_vm1, %v6493_v14  ;;  %4974 = vmatmul.mubr.msk.f32.gmra.mrb[24].mxu0 %vm238_vm1, %v6494_v16  ;;  %v6129_v14 = vld [vmem:[%s5366_s25 + $0x189] sm:$0xff] }
  0xe6   : > { %4752 = vmatprep.mubr.msk.f32.mxu1 %vm238_vm1, %v6495_v18  ;;  %4976 = vmatprep.mubr.msk.f32.mxu0 %vm238_vm1, %v6496_v20  ;;  %v4182_v18 = vld [vmem:[%s5366_s25 + $0x199] sm:$0xff] }
  0xe9   : > { %4753 = vmatmul.mubr.msk.f32.gmra.mrb[10].mxu1 %vm238_vm1, %v6497_v23  ;;  %4977 = vmatmul.mubr.msk.f32.gmra.mrb[26].mxu0 %vm238_vm1, %v6498_v3  ;;  %v4183_v23 = vld [vmem:[%s5366_s25 + $0x1a1] sm:$0xff]  ;;  %v6501_v3 = vld [vmem:[#allocation32_spill] sm:$0xff] }
  0xea   : > { %4755 = vmatprep.mubr.msk.f32.mxu1 %vm238_vm1, %v6499_v61  ;;  %4979 = vmatprep.mubr.msk.f32.mxu0 %vm238_vm1, %v6118_v1 }
  0xed   : > { %4756 = vmatmul.mubr.msk.f32.gmra.mrb[12].mxu1 %vm238_vm1, %v6500_v8  ;;  %4980 = vmatmul.mubr.msk.f32.gmra.mrb[28].mxu0 %vm238_vm1, %v6129_v14 }
  0xee   : > { %4758 = vmatprep.mubr.msk.f32.mxu1 %vm238_vm1, %v5807_v59  ;;  %4982 = vmatprep.mubr.msk.f32.mxu0 %vm238_vm1, %v4182_v18 }
  0xf1   : > { %4759 = vmatmul.mubr.msk.f32.gmra.mrb[14].mxu1 %vm238_vm1, %v6501_v3  ;;  %4983 = vmatmul.mubr.msk.f32.gmra.mrb[30].mxu0 %vm238_vm1, %v4183_v23 }
  0xf2   : > { %4761 = vmatprep.mubr.msk.f32.mxu1 %vm238_vm1, %v5821_v29  ;;  %4987 = vmatprep.mubr.msk.f32.mxu0 %vm238_vm1, %v5499_v27  ;;  %v6503_v27 = vld [vmem:[#allocation29_spill] sm:$0xff] }
  0xf3   : > { %v4248_v29 = vld [vmem:[%s5366_s25 + $0x19a] sm:$0xff] }
  0xf5   : > { %4762 = vmatmul.mubr.msk.f32.gmra.mrb[16].mxu1 %vm238_vm1, %v5837_v31  ;;  %4988 = vmatmul.mubr.msk.f32.vlgmr.msra.gmra.mrb[0].mxu0 %vm238_vm1, %v5517_v30  ;;  %v6504_v30 = vld [vmem:[#allocation14_spill] sm:$0xff]  ;;  %v6505_v31 = vld [vmem:[#allocation31_spill] sm:$0xff] }
  0xf6   : > { %4764 = vmatprep.mubr.msk.f32.mxu1 %vm238_vm1, %v5842_v0  ;;  %4990 = vmatprep.mubr.msk.f32.mxu0 %vm238_vm1, %v5525_v32  ;;  %v4249_v32 = vld [vmem:[%s5366_s25 + $0x1a2] sm:$0xff] }
  0xf9   : > { %4765 = vmatmul.mubr.msk.f32.gmra.mrb[18].mxu1 %vm238_vm1, %v5855_v28  ;;  %4991 = vmatmul.mubr.msk.f32.gmra.mrb[2].mxu0 %vm238_vm1, %v5541_v34 }
  0xfa   : > { %4767 = vmatprep.mubr.msk.f32.mxu1 %vm238_vm1, %v5858_v5  ;;  %4993 = vmatprep.mubr.msk.f32.mxu0 %vm238_vm1, %v5547_v36 }
  0xfd   : > { %4768 = vmatmul.mubr.msk.f32.gmra.mrb[20].mxu1 %vm238_vm1, %v5869_v7  ;;  %4994 = vmatmul.mubr.msk.f32.gmra.mrb[4].mxu0 %vm238_vm1, %v5561_v38 }
  0xfe   : > { %4770 = vmatprep.mubr.msk.f32.mxu1 %vm238_vm1, %v5872_v10  ;;  %4996 = vmatprep.mubr.msk.f32.mxu0 %vm238_vm1, %v5567_v40 }
 0x101   : > { %4771 = vmatmul.mubr.msk.f32.gmra.mrb[22].mxu1 %vm238_vm1, %v5883_v57  ;;  %4997 = vmatmul.mubr.msk.f32.gmra.mrb[6].mxu0 %vm238_vm1, %v5581_v42 }
 0x102   : > { %4773 = vmatprep.mubr.msk.f32.mxu1 %vm238_vm1, %v5886_v51  ;;  %4999 = vmatprep.mubr.msk.f32.mxu0 %vm238_vm1, %v5587_v44 }
 0x105   : > { %4774 = vmatmul.mubr.msk.f32.gmra.mrb[24].mxu1 %vm238_vm1, %v5897_v47  ;;  %5000 = vmatmul.mubr.msk.f32.gmra.mrb[8].mxu0 %vm238_vm1, %v5601_v46 }
 0x106   : > { %4776 = vmatprep.mubr.msk.f32.mxu1 %vm238_vm1, %v5900_v43  ;;  %5002 = vmatprep.mubr.msk.f32.mxu0 %vm238_vm1, %v5607_v48 }
 0x109   : > { %4777 = vmatmul.mubr.msk.f32.gmra.mrb[26].mxu1 %vm238_vm1, %v5911_v39  ;;  %5003 = vmatmul.mubr.msk.f32.gmra.mrb[10].mxu0 %vm238_vm1, %v5621_v50 }
 0x10a   : > { %4779 = vmatprep.mubr.msk.f32.mxu1 %vm238_vm1, %v5914_v35  ;;  %5005 = vmatprep.mubr.msk.f32.mxu0 %vm238_vm1, %v5627_v52  ;;  %v6282_v52 = vld [vmem:[%s6395_s2] ss:$0 sm:$0xff] }
 0x10d   : > { %4780 = vmatmul.mubr.msk.f32.gmra.mrb[28].mxu1 %vm238_vm1, %v5925_v62  ;;  %5006 = vmatmul.mubr.msk.f32.gmra.mrb[12].mxu0 %vm238_vm1, %v5641_v54 }
 0x10e   : > { %4782 = vmatprep.mubr.msk.f32.mxu1 %vm238_vm1, %v5980_v24  ;;  %5008 = vmatprep.mubr.msk.f32.mxu0 %vm238_vm1, %v5645_v56 }
 0x111   : > { %4783 = vmatmul.mubr.msk.f32.gmra.mrb[30].mxu1 %vm238_vm1, %v5991_v25  ;;  %5009 = vmatmul.mubr.msk.f32.gmra.mrb[14].mxu0 %vm238_vm1, %v5656_v58 }
 0x112   : > { %4811 = vmatprep.mubr.msk.f32.mxu1 %vm238_vm1, %v5496_v26  ;;  %5011 = vmatprep.mubr.msk.f32.mxu0 %vm238_vm1, %v5662_v60  ;;  %v6502_v26 = vld [vmem:[#allocation27_spill] sm:$0xff] }
 0x115   : > { %4812 = vmatmul.mubr.msk.f32.vlgmr.msra.gmra.mrb[16].mxu1 %vm238_vm1, %v6474_v11  ;;  %5012 = vmatmul.mubr.msk.f32.gmra.mrb[16].mxu0 %vm238_vm1, %v5680_v63 }
 0x116   : > { %4814 = vmatprep.mubr.msk.f32.mxu1 %vm238_vm1, %v6476_v13  ;;  %5014 = vmatprep.mubr.msk.f32.mxu0 %vm238_vm1, %v5688_v2 }
 0x119   : > { %4815 = vmatmul.mubr.msk.f32.gmra.mrb[18].mxu1 %vm238_vm1, %v6478_v15  ;;  %5015 = vmatmul.mubr.msk.f32.gmra.mrb[18].mxu0 %vm238_vm1, %v5704_v4 }
 0x11a   : > { %4817 = vmatprep.mubr.msk.f32.mxu1 %vm238_vm1, %v6480_v17  ;;  %5017 = vmatprep.mubr.msk.f32.mxu0 %vm238_vm1, %v5710_v6 }
 0x11d   : > { %4818 = vmatmul.mubr.msk.f32.gmra.mrb[20].mxu1 %vm238_vm1, %v6482_v19  ;;  %5018 = vmatmul.mubr.msk.f32.gmra.mrb[20].mxu0 %vm238_vm1, %v5724_v9 }
 0x11e   : > { %4820 = vmatprep.mubr.msk.f32.mxu1 %vm238_vm1, %v6484_v21  ;;  %5020 = vmatprep.mubr.msk.f32.mxu0 %vm238_vm1, %v5730_v55 }
 0x121   : > { %4821 = vmatmul.mubr.msk.f32.gmra.mrb[22].mxu1 %vm238_vm1, %v6486_v22  ;;  %5021 = vmatmul.mubr.msk.f32.gmra.mrb[22].mxu0 %vm238_vm1, %v5744_v53 }
 0x122   : > { %4823 = vmatprep.mubr.msk.f32.mxu1 %vm238_vm1, %v6488_v37  ;;  %5023 = vmatprep.mubr.msk.f32.mxu0 %vm238_vm1, %v5750_v49 }
 0x125   : > { %4824 = vmatmul.mubr.msk.f32.gmra.mrb[24].mxu1 %vm238_vm1, %v6490_v33  ;;  %5024 = vmatmul.mubr.msk.f32.gmra.mrb[24].mxu0 %vm238_vm1, %v5764_v45 }
 0x126   : > { %4826 = vmatprep.mubr.msk.f32.mxu1 %vm238_vm1, %v6492_v12  ;;  %5026 = vmatprep.mubr.msk.f32.mxu0 %vm238_vm1, %v5770_v41 }
 0x129   : > { %4827 = vmatmul.mubr.msk.f32.gmra.mrb[26].mxu1 %vm238_vm1, %v6494_v16  ;;  %5027 = vmatmul.mubr.msk.f32.gmra.mrb[26].mxu0 %vm238_vm1, %v6502_v26 }
 0x12a   : > { %4829 = vmatprep.mubr.msk.f32.mxu1 %vm238_vm1, %v6496_v20  ;;  %5029 = vmatprep.mubr.msk.f32.mxu0 %vm238_vm1, %v6503_v27 }
 0x12d   : > { %4830 = vmatmul.mubr.msk.f32.gmra.mrb[28].mxu1 %vm238_vm1, %v6504_v30  ;;  %5030 = vmatmul.mubr.msk.f32.gmra.mrb[28].mxu0 %vm238_vm1, %v6505_v31 }
 0x12e   : > { %4832 = vmatprep.mubr.msk.f32.mxu1 %vm238_vm1, %v6118_v1  ;;  %5032 = vmatprep.mubr.msk.f32.mxu0 %vm238_vm1, %v4248_v29 }
 0x131   : > { %4833 = vmatmul.mubr.msk.f32.gmra.mrb[30].mxu1 %vm238_vm1, %v6129_v14  ;;  %5033 = vmatmul.mubr.msk.f32.gmra.mrb[30].mxu0 %vm238_vm1, %v4249_v32 }
 0x1a8   : > { %v4739_v34 = vpop.f32.mrb[0].mxu1 }
 0x1a9   : > { %v1478_v35 = vpop.f32.mrb[1].mxu1 }
 0x1ac   : > { %v4742_v36 = vpop.f32.mrb[2].mxu1 }
 0x1ad   : > { %v1488_v38 = vpop.f32.mrb[3].mxu1 }
 0x1b0   : > { %v4745_v39 = vpop.f32.mrb[4].mxu1 }
 0x1b1   : > { %v1498_v40 = vpop.f32.mrb[5].mxu1 }
 0x1b4   : > { %v4748_v41 = vpop.f32.mrb[6].mxu1 }
 0x1b5   : > { %v1508_v42 = vpop.f32.mrb[7].mxu1 }
 0x1b8   : > { %v4751_v43 = vpop.f32.mrb[8].mxu1 }
 0x1b9   : > { %v1518_v44 = vpop.f32.mrb[9].mxu1 }
 0x1bc   : > { %v4754_v45 = vpop.f32.mrb[10].mxu1 }
 0x1bd   : > { %v1528_v46 = vpop.f32.mrb[11].mxu1 }
 0x1c0   : > { %v6271_v47 = vpop.f32.mrb[12].mxu1 }
 0x1c1   : > { %v6273_v48 = vpop.f32.mrb[13].mxu1 }
 0x1c4   : > { %v6275_v49 = vpop.f32.mrb[14].mxu1 }
 0x1c5   : > { %v6277_v50 = vpop.f32.mrb[15].mxu1 }
 0x1c8   : > { %v4989_v51 = vpop.f32.mrb[0].mxu0 }
 0x1c9   : > { %v5037_v53 = vadd.f32 %v4989_v51, %v4739_v34  ;;  %v3429_v54 = vpop.f32.mrb[1].mxu0 }
 0x1ca   : > { %v5038_v56 = vadd.f32 %v3429_v54, %v1478_v35 }
 0x1cb   : > { %v3628_v58 = vadd.f32 %v5037_v53, %v6282_v52 }
 0x1cc   : > { %v3627_v59 = vadd.f32 %v5038_v56, %v6282_v52  ;;  %v4992_v60 = vpop.f32.mrb[2].mxu0 }
 0x1cd   : > { %v3660_v62 = vmax.f32 %v3628_v58, 0.0  ;;  %v5039_v63 = vadd.f32 %v4992_v60, %v4742_v36  ;;  %v3439_v0 = vpop.f32.mrb[3].mxu0 }
 0x1ce   : > { %v3659_v2 = vmax.f32 %v3627_v59, 0.0  ;;  %v5040_v4 = vadd.f32 %v3439_v0, %v1488_v38 }
 0x1cf   : > { %3693 = vst.msk [vmem:[%s6289_s16 + $0x8] sm:$0xff] %vm3691_vm2, %v3660_v62  ;;  %v3630_v5 = vadd.f32 %v5039_v63, %v6282_v52 }
 0x1d0   : > { %3692 = vst.msk [vmem:[%s6289_s16] sm:$0xff] %vm3691_vm2, %v3659_v2  ;;  %v3629_v6 = vadd.f32 %v5040_v4, %v6282_v52  ;;  %v4995_v7 = vpop.f32.mrb[4].mxu0 }
 0x1d1   : > { %v3662_v9 = vmax.f32 %v3630_v5, 0.0  ;;  %v5041_v10 = vadd.f32 %v4995_v7, %v4745_v39  ;;  %v3449_v55 = vpop.f32.mrb[5].mxu0 }
 0x1d2   : > { %v3661_v57 = vmax.f32 %v3629_v6, 0.0  ;;  %v5042_v28 = vadd.f32 %v3449_v55, %v1498_v40 }
 0x1d3   : > { %3695 = vst.msk [vmem:[%s6289_s16 + $0x18] sm:$0xff] %vm3691_vm2, %v3662_v9  ;;  %v3632_v24 = vadd.f32 %v5041_v10, %v6282_v52 }
 0x1d4   : > { %3694 = vst.msk [vmem:[%s6289_s16 + $0x10] sm:$0xff] %vm3691_vm2, %v3661_v57  ;;  %v3631_v25 = vadd.f32 %v5042_v28, %v6282_v52  ;;  %v4998_v8 = vpop.f32.mrb[6].mxu0 }
 0x1d5   : > { %v3664_v11 = vmax.f32 %v3632_v24, 0.0  ;;  %v5043_v13 = vadd.f32 %v4998_v8, %v4748_v41  ;;  %v3459_v15 = vpop.f32.mrb[7].mxu0 }
 0x1d6   : > { %v3663_v17 = vmax.f32 %v3631_v25, 0.0  ;;  %v5044_v19 = vadd.f32 %v3459_v15, %v1508_v42 }
 0x1d7   : > { %3697 = vst.msk [vmem:[%s6289_s16 + $0x28] sm:$0xff] %vm3691_vm2, %v3664_v11  ;;  %v3634_v21 = vadd.f32 %v5043_v13, %v6282_v52 }
 0x1d8   : > { %3696 = vst.msk [vmem:[%s6289_s16 + $0x20] sm:$0xff] %vm3691_vm2, %v3663_v17  ;;  %v3633_v22 = vadd.f32 %v5044_v19, %v6282_v52  ;;  %v5001_v37 = vpop.f32.mrb[8].mxu0 }
 0x1d9   : > { %v3666_v33 = vmax.f32 %v3634_v21, 0.0  ;;  %v5045_v12 = vadd.f32 %v5001_v37, %v4751_v43  ;;  %v3469_v16 = vpop.f32.mrb[9].mxu0 }
 0x1da   : > { %v3665_v20 = vmax.f32 %v3633_v22, 0.0  ;;  %v5046_v1 = vadd.f32 %v3469_v16, %v1518_v44 }
 0x1db   : > { %3699 = vst.msk [vmem:[%s6289_s16 + $0x38] sm:$0xff] %vm3691_vm2, %v3666_v33  ;;  %v3636_v3 = vadd.f32 %v5045_v12, %v6282_v52 }
 0x1dc   : > { %3698 = vst.msk [vmem:[%s6289_s16 + $0x30] sm:$0xff] %vm3691_vm2, %v3665_v20  ;;  %v3635_v61 = vadd.f32 %v5046_v1, %v6282_v52  ;;  %v5004_v14 = vpop.f32.mrb[10].mxu0 }
 0x1dd   : > { %v3668_v18 = vmax.f32 %v3636_v3, 0.0  ;;  %v5047_v23 = vadd.f32 %v5004_v14, %v4754_v45  ;;  %v3479_v26 = vpop.f32.mrb[11].mxu0 }
 0x1de   : > { %v3667_v27 = vmax.f32 %v3635_v61, 0.0  ;;  %v5048_v29 = vadd.f32 %v3479_v26, %v1528_v46 }
 0x1df   : > { %3701 = vst.msk [vmem:[%s6289_s16 + $0x48] sm:$0xff] %vm3691_vm2, %v3668_v18  ;;  %v3638_v30 = vadd.f32 %v5047_v23, %v6282_v52 }
 0x1e0   : > { %3700 = vst.msk [vmem:[%s6289_s16 + $0x40] sm:$0xff] %vm3691_vm2, %v3667_v27  ;;  %v3637_v31 = vadd.f32 %v5048_v29, %v6282_v52  ;;  %v5007_v32 = vpop.f32.mrb[12].mxu0 }
 0x1e1   : > { %v3670_v34 = vmax.f32 %v3638_v30, 0.0  ;;  %v5049_v35 = vadd.f32 %v5007_v32, %v6271_v47  ;;  %v3489_v36 = vpop.f32.mrb[13].mxu0 }
 0x1e2   : > { %v3669_v38 = vmax.f32 %v3637_v31, 0.0  ;;  %v5050_v39 = vadd.f32 %v3489_v36, %v6273_v48 }
 0x1e3   : > { %3703 = vst.msk [vmem:[%s6289_s16 + $0x58] sm:$0xff] %vm3691_vm2, %v3670_v34  ;;  %v3640_v40 = vadd.f32 %v5049_v35, %v6282_v52 }
 0x1e4   : > { %3702 = vst.msk [vmem:[%s6289_s16 + $0x50] sm:$0xff] %vm3691_vm2, %v3669_v38  ;;  %v3639_v41 = vadd.f32 %v5050_v39, %v6282_v52  ;;  %v5010_v42 = vpop.f32.mrb[14].mxu0 }
 0x1e5   : > { %v3672_v43 = vmax.f32 %v3640_v40, 0.0  ;;  %v5051_v44 = vadd.f32 %v5010_v42, %v6275_v49  ;;  %v3499_v45 = vpop.f32.mrb[15].mxu0 }
 0x1e6   : > { %v3671_v46 = vmax.f32 %v3639_v41, 0.0  ;;  %v5052_v47 = vadd.f32 %v3499_v45, %v6277_v50 }
 0x1e7   : > { %3705 = vst.msk [vmem:[%s6289_s16 + $0x68] sm:$0xff] %vm3691_vm2, %v3672_v43  ;;  %v3642_v48 = vadd.f32 %v5051_v44, %v6282_v52 }
 0x1e8   : > { %3704 = vst.msk [vmem:[%s6289_s16 + $0x60] sm:$0xff] %vm3691_vm2, %v3671_v46  ;;  %v3641_v51 = vadd.f32 %v5052_v47, %v6282_v52  ;;  %v4813_v53 = vpop.f32.mrb[16].mxu1  ;;  %v5013_v54 = vpop.f32.mrb[16].mxu0 }
 0x1e9   : > { %v3674_v56 = vmax.f32 %v3642_v48, 0.0  ;;  %v5053_v58 = vadd.f32 %v5013_v54, %v4813_v53  ;;  %v1948_v59 = vpop.f32.mrb[17].mxu1  ;;  %v3509_v49 = vpop.f32.mrb[17].mxu0 }
 0x1ea   : > { %v3673_v60 = vmax.f32 %v3641_v51, 0.0  ;;  %v5054_v62 = vadd.f32 %v3509_v49, %v1948_v59 }
 0x1eb   : > { %3707 = vst.msk [vmem:[%s6289_s16 + $0x78] sm:$0xff] %vm3691_vm2, %v3674_v56  ;;  %v3644_v50 = vadd.f32 %v5053_v58, %v6282_v52 }
 0x1ec   : > { %3706 = vst.msk [vmem:[%s6289_s16 + $0x70] sm:$0xff] %vm3691_vm2, %v3673_v60  ;;  %v3643_v63 = vadd.f32 %v5054_v62, %v6282_v52  ;;  %v4816_v0 = vpop.f32.mrb[18].mxu1  ;;  %v5016_v2 = vpop.f32.mrb[18].mxu0 }
 0x1ed   : > { %v3676_v4 = vmax.f32 %v3644_v50, 0.0  ;;  %v5055_v5 = vadd.f32 %v5016_v2, %v4816_v0  ;;  %v1958_v6 = vpop.f32.mrb[19].mxu1  ;;  %v3519_v7 = vpop.f32.mrb[19].mxu0 }
 0x1ee   : > { %v3675_v9 = vmax.f32 %v3643_v63, 0.0  ;;  %v5056_v10 = vadd.f32 %v3519_v7, %v1958_v6 }
 0x1ef   : > { %3709 = vst.msk [vmem:[%s6289_s16 + $0x88] sm:$0xff] %vm3691_vm2, %v3676_v4  ;;  %v3646_v55 = vadd.f32 %v5055_v5, %v6282_v52 }
 0x1f0   : > { %3708 = vst.msk [vmem:[%s6289_s16 + $0x80] sm:$0xff] %vm3691_vm2, %v3675_v9  ;;  %v3645_v57 = vadd.f32 %v5056_v10, %v6282_v52  ;;  %v4819_v28 = vpop.f32.mrb[20].mxu1  ;;  %v5019_v24 = vpop.f32.mrb[20].mxu0 }
 0x1f1   : > { %v3678_v25 = vmax.f32 %v3646_v55, 0.0  ;;  %v5057_v8 = vadd.f32 %v5019_v24, %v4819_v28  ;;  %v1968_v11 = vpop.f32.mrb[21].mxu1  ;;  %v3529_v13 = vpop.f32.mrb[21].mxu0 }
 0x1f2   : > { %v3677_v15 = vmax.f32 %v3645_v57, 0.0  ;;  %v5058_v17 = vadd.f32 %v3529_v13, %v1968_v11 }
 0x1f3   : > { %3711 = vst.msk [vmem:[%s6289_s16 + $0x98] sm:$0xff] %vm3691_vm2, %v3678_v25  ;;  %v3648_v19 = vadd.f32 %v5057_v8, %v6282_v52 }
 0x1f4   : > { %3710 = vst.msk [vmem:[%s6289_s16 + $0x90] sm:$0xff] %vm3691_vm2, %v3677_v15  ;;  %v3647_v21 = vadd.f32 %v5058_v17, %v6282_v52  ;;  %v4822_v22 = vpop.f32.mrb[22].mxu1  ;;  %v5022_v37 = vpop.f32.mrb[22].mxu0 }
 0x1f5   : > { %v3680_v33 = vmax.f32 %v3648_v19, 0.0  ;;  %v5059_v12 = vadd.f32 %v5022_v37, %v4822_v22  ;;  %v1978_v16 = vpop.f32.mrb[23].mxu1  ;;  %v3539_v20 = vpop.f32.mrb[23].mxu0 }
 0x1f6   : > { %v3679_v1 = vmax.f32 %v3647_v21, 0.0  ;;  %v5060_v3 = vadd.f32 %v3539_v20, %v1978_v16 }
 0x1f7   : > { %3713 = vst.msk [vmem:[%s6289_s16 + $0xa8] sm:$0xff] %vm3691_vm2, %v3680_v33  ;;  %v3650_v61 = vadd.f32 %v5059_v12, %v6282_v52 }
 0x1f8   : > { %3712 = vst.msk [vmem:[%s6289_s16 + $0xa0] sm:$0xff] %vm3691_vm2, %v3679_v1  ;;  %v3649_v14 = vadd.f32 %v5060_v3, %v6282_v52  ;;  %v4825_v18 = vpop.f32.mrb[24].mxu1  ;;  %v5025_v23 = vpop.f32.mrb[24].mxu0 }
 0x1f9   : > { %v3682_v26 = vmax.f32 %v3650_v61, 0.0  ;;  %v5061_v27 = vadd.f32 %v5025_v23, %v4825_v18  ;;  %v1988_v29 = vpop.f32.mrb[25].mxu1  ;;  %v3549_v30 = vpop.f32.mrb[25].mxu0 }
 0x1fa   : > { %v3681_v31 = vmax.f32 %v3649_v14, 0.0  ;;  %v5062_v32 = vadd.f32 %v3549_v30, %v1988_v29 }
 0x1fb   : > { %3715 = vst.msk [vmem:[%s6289_s16 + $0xb8] sm:$0xff] %vm3691_vm2, %v3682_v26  ;;  %v3652_v34 = vadd.f32 %v5061_v27, %v6282_v52 }
 0x1fc   : > { %3714 = vst.msk [vmem:[%s6289_s16 + $0xb0] sm:$0xff] %vm3691_vm2, %v3681_v31  ;;  %v3651_v35 = vadd.f32 %v5062_v32, %v6282_v52  ;;  %v4828_v36 = vpop.f32.mrb[26].mxu1  ;;  %v5028_v38 = vpop.f32.mrb[26].mxu0 }
 0x1fd   : > { %v3684_v39 = vmax.f32 %v3652_v34, 0.0  ;;  %v5063_v40 = vadd.f32 %v5028_v38, %v4828_v36  ;;  %v1998_v41 = vpop.f32.mrb[27].mxu1  ;;  %v3559_v42 = vpop.f32.mrb[27].mxu0 }
 0x1fe   : > { %v3683_v43 = vmax.f32 %v3651_v35, 0.0  ;;  %v5064_v44 = vadd.f32 %v3559_v42, %v1998_v41 }
 0x1ff   : > { %3717 = vst.msk [vmem:[%s6289_s16 + $0xc8] sm:$0xff] %vm3691_vm2, %v3684_v39  ;;  %v3654_v45 = vadd.f32 %v5063_v40, %v6282_v52 }
 0x200   : > { %3716 = vst.msk [vmem:[%s6289_s16 + $0xc0] sm:$0xff] %vm3691_vm2, %v3683_v43  ;;  %v3653_v46 = vadd.f32 %v5064_v44, %v6282_v52  ;;  %v4831_v47 = vpop.f32.mrb[28].mxu1  ;;  %v5031_v48 = vpop.f32.mrb[28].mxu0 }
 0x201   : > { %v3686_v51 = vmax.f32 %v3654_v45, 0.0  ;;  %v5065_v53 = vadd.f32 %v5031_v48, %v4831_v47  ;;  %v2008_v54 = vpop.f32.mrb[29].mxu1  ;;  %v3569_v56 = vpop.f32.mrb[29].mxu0 }
 0x202   : > { %v3685_v58 = vmax.f32 %v3653_v46, 0.0  ;;  %v5066_v59 = vadd.f32 %v3569_v56, %v2008_v54 }
 0x203   : > { %3719 = vst.msk [vmem:[%s6289_s16 + $0xd8] sm:$0xff] %vm3691_vm2, %v3686_v51  ;;  %v3656_v49 = vadd.f32 %v5065_v53, %v6282_v52 }
 0x204   : > { %3718 = vst.msk [vmem:[%s6289_s16 + $0xd0] sm:$0xff] %vm3691_vm2, %v3685_v58  ;;  %v3655_v60 = vadd.f32 %v5066_v59, %v6282_v52  ;;  %v4834_v62 = vpop.f32.mrb[30].mxu1  ;;  %v5034_v50 = vpop.f32.mrb[30].mxu0 }
 0x205   : > { %v3688_v63 = vmax.f32 %v3656_v49, 0.0  ;;  %v5067_v0 = vadd.f32 %v5034_v50, %v4834_v62  ;;  %v2018_v2 = vpop.f32.mrb[31].mxu1  ;;  %v3579_v4 = vpop.f32.mrb[31].mxu0 }
 0x206   : > { %v3687_v5 = vmax.f32 %v3655_v60, 0.0  ;;  %v5068_v6 = vadd.f32 %v3579_v4, %v2018_v2 }
 0x207   : > { %3721 = vst.msk [vmem:[%s6289_s16 + $0xe8] sm:$0xff] %vm3691_vm2, %v3688_v63  ;;  %v3658_v7 = vadd.f32 %v5067_v0, %v6282_v52 }
 0x208   : > { %3720 = vst.msk [vmem:[%s6289_s16 + $0xe0] sm:$0xff] %vm3691_vm2, %v3687_v5  ;;  %v3657_v9 = vadd.f32 %v5068_v6, %v6282_v52 }
 0x209   : > { %v3690_v10 = vmax.f32 %v3658_v7, 0.0 }
 0x20a   : > { %v3689_v55 = vmax.f32 %v3657_v9, 0.0 }
 0x20b   : > { %3723 = vst.msk [vmem:[%s6289_s16 + $0xf8] sm:$0xff] %vm3691_vm2, %v3690_v10 }
 0x20c   : > { %3722 = vst.msk [vmem:[%s6289_s16 + $0xf0] sm:$0xff] %vm3691_vm2, %v3689_v55 }
 0x20d PF: > { %s13_s12 = sadd.s32 1, %s5308_s12  }
 0x20e   : > { %p10_p4 = scmp.ge.s32.totalorder %s13_s12, 4  }
 0x210   :  { %12 = sbr.rel (!%p10_p4) target bundleno = 1 (0x1), region = 72 }

</bundles_post_ra>
